<compile_context>
chip_gen: v6e
topology: v6e:2x2x1
jax: 0.10.0
libtpu: 0.0.40
codegen_flags: <defaults>
</compile_context>

<pallas_src>
import jax
import jax.numpy as jnp
from jax.experimental import pallas as pl
from jax.experimental.pallas import tpu as pltpu

NUM_CLASSES = 6
EUCLIDEAN_DIM = 3
HIDDEN_DIM = 32            # m_dim of the EGNN and hidden dim of the final MLP
GNN_SIZE = 1
IDX = (0, 2)
K_NEIGHBORS = 6
CLAMP_VAL = 1.0            # coor_weights_clamp_value
NORM_COORS_CONSTANT = 1.0
COORS_SCALE_INIT = 1e-2    # lucidrains CoorsNorm scale init
LN_EPS = 1e-5

FEAT_DIM = NUM_CLASSES                    # 6
EDGE_IN = 2 * FEAT_DIM + 1                # 13
EDGE_HIDDEN = 2 * EDGE_IN                 # 26
M_DIM = HIDDEN_DIM                        # 32
COORS_HIDDEN = 4 * M_DIM                  # 128
NODE_HIDDEN = 2 * FEAT_DIM                # 12
NODE_W = FEAT_DIM + EUCLIDEAN_DIM         # 9   packed [feats | coors]
EDGE_W = FEAT_DIM + 1 + EUCLIDEAN_DIM     # 10  packed [feats_j | dist | rel_coors]

MXU_DTYPE = jnp.bfloat16                  # matmul operands only; accumulation stays f32
MAX_TILE_NODES = 512                      # 512 nodes * K=6 -> 3072 edge rows per matmul
VMEM_LIMIT_BYTES = 48 * 1024 * 1024       # above all scoped defaults, below v7x physical


def _round_up(x, m):
    return ((x + m - 1) // m) * m


def _detect_bf16_eup():
    # bf16 transcendentals only where the EUP/VPU support it (v6e / v7x).
    try:
        kind = jax.devices()[0].device_kind.lower()
    except Exception:
        return False
    return any(tag in kind for tag in ("v6", "v7", "7x"))


EUP_DTYPE = jnp.bfloat16 if _detect_bf16_eup() else jnp.float32


def _silu(x):
    # Transcendental (sigmoid) in EUP_DTYPE; multiply stays in x's dtype (f32).
    return x * jax.nn.sigmoid(x.astype(EUP_DTYPE)).astype(x.dtype)


# ----------------------------------------------------------------------------
# Packed-weight layout: two lane-dense buffers.
#   * matrix buffer (bf16): MXU operands, 16-row (bf16 sublane tile) aligned.
#   * vector buffer (f32) : biases / gate row / cw1 row / LN params / scalars.
# ----------------------------------------------------------------------------
def _build_layout(entries, align):
    layout = {}
    r = 0
    for name, rows, cols in entries:
        r = _round_up(r, align)
        layout[name] = (r, rows, cols)
        r += rows
    return layout, _round_up(r, align)


_MAT_ENTRIES = [
    ('ew0_i', FEAT_DIM, EDGE_HIDDEN),        # edge MLP L0, feats_i rows of ew0
    ('ew0_jd', FEAT_DIM + 1, EDGE_HIDDEN),   # edge MLP L0, [feats_j | dist] rows (fused)
    ('ew1', EDGE_HIDDEN, M_DIM),             # edge MLP L1
    ('cw0', M_DIM, COORS_HIDDEN),            # coors MLP L0
    ('nw0_f', FEAT_DIM, NODE_HIDDEN),        # node MLP L0 (normed-feats part)
    ('nw0_m', M_DIM, NODE_HIDDEN),           # node MLP L0 (message part)
    ('nw1', NODE_HIDDEN, FEAT_DIM),          # node MLP L1
]
_MAT_LAYOUT, _MAT_ROWS = _build_layout(_MAT_ENTRIES, 16)

_VEC_ENTRIES = [
    ('eb0', 1, EDGE_HIDDEN),
    ('eb1', 1, M_DIM),
    ('gw_row', 1, M_DIM),                    # soft-edge gate (as a row)
    ('scalars', 1, 3),                       # [gb, cb1, coors_scale]
    ('cb0', 1, COORS_HIDDEN),
    ('cw1_row', 1, COORS_HIDDEN),            # coors MLP output (as a row)
    ('lng', 1, FEAT_DIM),                    # node LayerNorm gamma
    ('lnb', 1, FEAT_DIM),                    # node LayerNorm beta
    ('nb0', 1, NODE_HIDDEN),
    ('nb1', 1, FEAT_DIM),
]
_VEC_LAYOUT, _VEC_ROWS = _build_layout(_VEC_ENTRIES, 8)


def _pack_mat(params):
    def put(buf, name, arr):
        r, h, c = _MAT_LAYOUT[name]
        return buf.at[r:r + h, 0:c].set(arr.astype(jnp.float32))

    buf = jnp.zeros((_MAT_ROWS, 128), jnp.float32)
    buf = put(buf, 'ew0_i', params['ew0'][0:FEAT_DIM])
    buf = put(buf, 'ew0_jd', params['ew0'][FEAT_DIM:2 * FEAT_DIM + 1])
    buf = put(buf, 'ew1', params['ew1'])
    buf = put(buf, 'cw0', params['cw0'])
    buf = put(buf, 'nw0_f', params['nw0'][0:FEAT_DIM])
    buf = put(buf, 'nw0_m', params['nw0'][FEAT_DIM:])
    buf = put(buf, 'nw1', params['nw1'])
    return buf.astype(MXU_DTYPE)             # pre-cast once; no per-step casts


def _pack_vec(params):
    def put(buf, name, arr):
        r, h, c = _VEC_LAYOUT[name]
        return buf.at[r:r + h, 0:c].set(arr.astype(jnp.float32))

    buf = jnp.zeros((_VEC_ROWS, 128), jnp.float32)
    buf = put(buf, 'eb0', params['eb0'])
    buf = put(buf, 'eb1', params['eb1'])
    buf = put(buf, 'gw_row', params['gw'].T)
    scal = jnp.concatenate([params['gb'].reshape(1, 1),
                            params['cb1'].reshape(1, 1),
                            params['cscale'].reshape(1, 1)], axis=1)
    buf = put(buf, 'scalars', scal)
    buf = put(buf, 'cb0', params['cb0'])
    buf = put(buf, 'cw1_row', params['cw1'].T)
    buf = put(buf, 'lng', params['lng'])
    buf = put(buf, 'lnb', params['lnb'])
    buf = put(buf, 'nb0', params['nb0'])
    buf = put(buf, 'nb1', params['nb1'])
    return buf


# ----------------------------------------------------------------------------
# Kernel: one EGNN layer over a row-tile of TILE_N nodes (B*N folded/padded),
# with a neighbor-major (k, TILE_N, EDGE_W) edge tile.  Output is packed
# [feats_out | coors_out].
# ----------------------------------------------------------------------------
def egnn_kernel(node_ref, edge_ref, wm_ref, wv_ref, out_ref):
    t = node_ref.shape[0]                        # nodes in this tile (static)
    k = edge_ref.shape[0]                        # neighbors per node (static)

    node = node_ref[...]                         # (t, 9)
    feats = node[:, 0:FEAT_DIM]                  # (t, 6)
    coors = node[:, FEAT_DIM:NODE_W]             # (t, 3)

    # neighbor-major edge tile; t is a multiple of 8 so this reshape is free.
    edge = edge_ref[...].reshape(t * k, EDGE_W)  # (k*t, 10)
    feats_jd = edge[:, 0:FEAT_DIM + 1]           # (k*t, 7) = [feats_j | dist]
    rel_coors = edge[:, FEAT_DIM + 1:EDGE_W]     # (k*t, 3)

    def wm(name):                                # bf16 matrix weights
        r, h, c = _MAT_LAYOUT[name]
        return wm_ref[r:r + h, 0:c]

    def wv(name):                                # f32 vector weights
        r, h, c = _VEC_LAYOUT[name]
        return wv_ref[r:r + h, 0:c]

    def mm(a, b):  # bf16 MXU matmul, f32 accumulation (b already bf16)
        return jnp.dot(a.astype(MXU_DTYPE), b, preferred_element_type=jnp.float32)

    scal = wv('scalars')                         # (1, 3) = [gb, cb1, coors_scale]

    # --- edge MLP layer 0: fused [feats_j|dist] matmul + leading-axis broadcast ---
    h_edge = mm(feats_jd, wm('ew0_jd')) + wv('eb0')                      # (k*t, 26)
    h_node = mm(feats, wm('ew0_i'))                                      # (t, 26)
    h0 = _silu(h_edge.reshape(k, t, EDGE_HIDDEN) + h_node[None, :, :])   # slab adds
    h0 = h0.reshape(t * k, EDGE_HIDDEN)

    # --- edge MLP layer 1 (dropout = identity at inference) ---
    m_ij = _silu(mm(h0, wm('ew1')) + wv('eb1'))                          # (k*t, 32)

    # --- soft edge gate: VPU mul + lane reduction (no N=1 MXU matmul) ---
    gate = jax.nn.sigmoid(
        jnp.sum(m_ij * wv('gw_row'), axis=-1, keepdims=True) + scal[:, 0:1])
    m_ij = m_ij * gate

    # --- coordinate-weight MLP (m_dim -> 4*m_dim -> 1), clamped ---
    ch = _silu(mm(m_ij, wm('cw0')) + wv('cb0'))                          # (k*t, 128)
    coor_w = jnp.sum(ch * wv('cw1_row'), axis=-1, keepdims=True) + scal[:, 1:2]
    coor_w = jnp.clip(coor_w, -CLAMP_VAL, CLAMP_VAL)                     # (k*t, 1)

    # --- CoorsNorm on relative coordinates + coordinate update ---
    norm = jnp.sqrt(jnp.sum(rel_coors * rel_coors, axis=-1, keepdims=True))
    inv = pl.reciprocal(norm + NORM_COORS_CONSTANT, approx=True)
    rel_n = rel_coors * inv * scal[:, 2:3]
    coor_delta = jnp.sum((coor_w * rel_n).reshape(k, t, EUCLIDEAN_DIM), axis=0)
    coors_out = coors + coor_delta                                       # (t, 3)

    # --- message pooling ('sum') over neighbors: leading-axis vreg adds ---
    m_i = jnp.sum(m_ij.reshape(k, t, M_DIM), axis=0)                     # (t, 32)

    # --- node LayerNorm + node MLP with residual (split nw0, no lane concat) ---
    mu = jnp.mean(feats, axis=-1, keepdims=True)
    var = jnp.mean((feats - mu) ** 2, axis=-1, keepdims=True)
    normed = (feats - mu) * jax.lax.rsqrt(var + LN_EPS) * wv('lng') + wv('lnb')
    nh = _silu(mm(normed, wm('nw0_f')) + mm(m_i, wm('nw0_m')) + wv('nb0'))
    feats_out = mm(nh, wm('nw1')) + wv('nb1') + feats                    # (t, 6)

    # two direct slice stores (no concatenated temp before the masked store)
    out_ref[:, 0:FEAT_DIM] = feats_out
    out_ref[:, FEAT_DIM:NODE_W] = coors_out


# ----------------------------------------------------------------------------
# Wrappers
# ----------------------------------------------------------------------------
def egnn_layer(feats, coors, wmat, wvec):
    B, N, _ = feats.shape
    k = min(K_NEIGHBORS, N)
    total = B * N

    # KNN selection + gathers (data-dependent indexing) stay in plain JAX.
    sq = jnp.sum(coors * coors, axis=-1)                              # (B, N)
    gram = jnp.einsum('bnd,bmd->bnm', coors, coors)                   # (B, N, N)
    dist = sq[:, :, None] + sq[:, None, :] - 2.0 * gram               # squared dist
    _, nbhd_idx = jax.lax.top_k(-dist, k)                             # includes self
    bidx = jnp.arange(B)[:, None, None]
    feats_j = feats[bidx, nbhd_idx]                                   # (B, N, k, 6)
    coors_j = coors[bidx, nbhd_idx]                                   # (B, N, k, 3)
    rel_coors = coors[:, :, None, :] - coors_j                        # (B, N, k, 3)
    rel_dist = jnp.sum(rel_coors * rel_coors, axis=-1, keepdims=True) # (B, N, k, 1)

    node_flat = jnp.concatenate([feats, coors], axis=-1).reshape(total, NODE_W)
    # Neighbor-major edge buffer: (k, B*N, EDGE_W).  Transpose is cheap XLA-side
    # plumbing; it lets the kernel broadcast/reduce over the leading k axis.
    edge_km = jnp.transpose(
        jnp.concatenate([feats_j, rel_dist, rel_coors], axis=-1)
        .reshape(total, k, EDGE_W), (1, 0, 2))                        # (k, B*N, 10)

    # Fold B*N into row tiles (padded with zero rows; padded rows are sliced off).
    tile_n = min(MAX_TILE_NODES, _round_up(total, 8))
    padded = _round_up(total, tile_n)
    if padded != total:
        node_flat = jnp.pad(node_flat, ((0, padded - total), (0, 0)))
        edge_km = jnp.pad(edge_km, ((0, 0), (0, padded - total), (0, 0)))

    out = pl.pallas_call(
        egnn_kernel,
        out_shape=jax.ShapeDtypeStruct((padded, NODE_W), jnp.float32),
        grid=(padded // tile_n,),
        in_specs=[
            pl.BlockSpec((tile_n, NODE_W), lambda i: (i, 0)),
            pl.BlockSpec((k, tile_n, EDGE_W), lambda i: (0, i, 0)),
            pl.BlockSpec((_MAT_ROWS, 128), lambda i: (0, 0)),   # resident across steps
            pl.BlockSpec((_VEC_ROWS, 128), lambda i: (0, 0)),   # resident across steps
        ],
        out_specs=pl.BlockSpec((tile_n, NODE_W), lambda i: (i, 0)),
        compiler_params=pltpu.CompilerParams(
            dimension_semantics=("parallel",),
            vmem_limit_bytes=VMEM_LIMIT_BYTES),
    )(node_flat.astype(jnp.float32), edge_km.astype(jnp.float32), wmat, wvec)

    return out[:total].reshape(B, N, NODE_W)      # packed [feats_out | coors_out]


def arnet_forward(x, params, mask=None):
    if mask is not None:
        # TODO(synk): mask path (masked EGNN messages + masked mean pooling) not implemented.
        raise NotImplementedError("mask != None path not implemented")
    x = x.astype(jnp.float32)
    B = x.shape[0]
    feats = x[:, :, :NUM_CLASSES]
    coors = x[:, :, NUM_CLASSES:]
    wmat = _pack_mat(params)
    wvec = _pack_vec(params)
    for _ in range(GNN_SIZE):
        z = egnn_layer(feats, coors, wmat, wvec)   # (B, N, 9) == cat(feats, coors)
        feats = z[..., :NUM_CLASSES]
        coors = z[..., NUM_CLASSES:]

    # Mean pooling + 9->32->36 head MLP: a few hundred FLOPs per batch element.
    # Left to XLA — a dedicated pallas_call launch + DMA costs more than the compute.
    zm = jnp.mean(z, axis=1)                                          # (B, 9)
    h = jax.nn.relu(zm @ params['mw1'] + params['mb1'])
    y = h @ params['mw2'] + params['mb2']                             # (B, 36)
    y = y.reshape(B, IDX[1] - IDX[0], (NUM_CLASSES + EUCLIDEAN_DIM) * 2)
    # F.pad(z, (0, 0, idx[0], 29 - idx[1], 0, 0)) -> pad node axis to length 29
    return jnp.pad(y, ((0, 0), (IDX[0], 29 - IDX[1]), (0, 0)))


def init_params(key):
    def lin(k, fan_in, fan_out):
        k1, k2 = jax.random.split(k)
        w = jax.random.normal(k1, (fan_in, fan_out), jnp.float32) / jnp.sqrt(fan_in)
        b = 0.01 * jax.random.normal(k2, (1, fan_out), jnp.float32)
        return w, b

    keys = jax.random.split(key, 9)
    ein = 2 * NUM_CLASSES + 1
    out_dim = (IDX[1] - IDX[0]) * (NUM_CLASSES + EUCLIDEAN_DIM) * 2
    p = {}
    p['ew0'], p['eb0'] = lin(keys[0], ein, ein * 2)                         # edge MLP
    p['ew1'], p['eb1'] = lin(keys[1], ein * 2, HIDDEN_DIM)
    p['gw'], p['gb'] = lin(keys[2], HIDDEN_DIM, 1)                          # soft edge gate
    p['cw0'], p['cb0'] = lin(keys[3], HIDDEN_DIM, HIDDEN_DIM * 4)           # coors MLP
    p['cw1'], p['cb1'] = lin(keys[4], HIDDEN_DIM * 4, 1)
    p['lng'] = jnp.ones((1, NUM_CLASSES), jnp.float32)                      # node LayerNorm
    p['lnb'] = jnp.zeros((1, NUM_CLASSES), jnp.float32)
    p['cscale'] = jnp.full((1, 1), COORS_SCALE_INIT, jnp.float32)           # CoorsNorm scale
    p['nw0'], p['nb0'] = lin(keys[5], NUM_CLASSES + HIDDEN_DIM, NUM_CLASSES * 2)  # node MLP
    p['nw1'], p['nb1'] = lin(keys[6], NUM_CLASSES * 2, NUM_CLASSES)
    p['mw1'], p['mb1'] = lin(keys[7], NUM_CLASSES + EUCLIDEAN_DIM, HIDDEN_DIM)    # head MLP
    p['mw2'], p['mb2'] = lin(keys[8], HIDDEN_DIM, out_dim)
    return p


if __name__ == "__main__":
    B, N = 2, 8
    key = jax.random.PRNGKey(0)
    kx, kp = jax.random.split(key)
    x = jax.random.normal(kx, (B, N, NUM_CLASSES + EUCLIDEAN_DIM), jnp.float32)
    params = init_params(kp)

    fwd = jax.jit(arnet_forward)
    out = jax.block_until_ready(fwd(x, params))
    assert out.shape == (B, 29, (NUM_CLASSES + EUCLIDEAN_DIM) * 2), out.shape
    assert bool(jnp.all(jnp.isfinite(out)))
    print("KERNEL_OK")
</pallas_src>

<mosaic_0001>
module attributes {stable_mosaic.version = 11 : i64} {
  func.func @egnn_kernel(%arg0: i32, %arg1: memref<16x9xf32, #tpu.memory_space<vmem>>, %arg2: memref<6x16x10xf32, #tpu.memory_space<vmem>>, %arg3: memref<160x128xbf16, #tpu.memory_space<vmem>>, %arg4: memref<80x128xf32, #tpu.memory_space<vmem>>, %arg5: memref<16x9xf32, #tpu.memory_space<vmem>>) attributes {dimension_semantics = [#tpu.dimension_semantics<parallel>], iteration_bounds = array<i64: 1>, scalar_prefetch = 0 : i64, scratch_operands = 0 : i64, tpu.core_type = #tpu.core_type<tc>, window_params = [{transform_indices = @transform_0, window_bounds = array<i64: 16, 9>}, {transform_indices = @transform_1, window_bounds = array<i64: 6, 16, 10>}, {pipeline_mode = #tpu.pipeline_mode<synchronous>, transform_indices = @transform_2, window_bounds = array<i64: 160, 128>}, {pipeline_mode = #tpu.pipeline_mode<synchronous>, transform_indices = @transform_3, window_bounds = array<i64: 80, 128>}, {transform_indices = @transform_4, window_bounds = array<i64: 16, 9>}]} {
    %c0 = arith.constant 0 : index
    %c0_0 = arith.constant 0 : index
    %0 = vector.load %arg1[%c0, %c0_0] : memref<16x9xf32, #tpu.memory_space<vmem>>, vector<16x9xf32>
    %1 = vector.extract_strided_slice %0 {offsets = [0, 0], sizes = [16, 6], strides = [1, 1]} : vector<16x9xf32> to vector<16x6xf32>
    %2 = vector.extract_strided_slice %0 {offsets = [0, 6], sizes = [16, 3], strides = [1, 1]} : vector<16x9xf32> to vector<16x3xf32>
    %c0_1 = arith.constant 0 : index
    %c0_2 = arith.constant 0 : index
    %c0_3 = arith.constant 0 : index
    %3 = vector.load %arg2[%c0_1, %c0_2, %c0_3] : memref<6x16x10xf32, #tpu.memory_space<vmem>>, vector<6x16x10xf32>
    %4 = vector.shape_cast %3 : vector<6x16x10xf32> to vector<96x10xf32>
    %5 = vector.extract_strided_slice %4 {offsets = [0, 0], sizes = [96, 7], strides = [1, 1]} : vector<96x10xf32> to vector<96x7xf32>
    %6 = vector.extract_strided_slice %4 {offsets = [0, 7], sizes = [96, 3], strides = [1, 1]} : vector<96x10xf32> to vector<96x3xf32>
    %c24 = arith.constant 24 : index
    %c0_4 = arith.constant 0 : index
    %7 = vector.load %arg4[%c24, %c0_4] : memref<80x128xf32, #tpu.memory_space<vmem>>, vector<1x3xf32>
    %c16 = arith.constant 16 : index
    %c0_5 = arith.constant 0 : index
    %8 = vector.load %arg3[%c16, %c0_5] : memref<160x128xbf16, #tpu.memory_space<vmem>>, vector<7x26xbf16>
    %9 = arith.truncf %5 : vector<96x7xf32> to vector<96x7xbf16>
    %cst = arith.constant dense<0.000000e+00> : vector<96x26xf32>
    %10 = tpu.matmul %9, %8, %cst {dimension_numbers = #tpu.dot_dimension_numbers<[1], [0], [0], [1], [0, 0, 1, 1], [], []>} : vector<96x7xbf16>, vector<7x26xbf16>, vector<96x26xf32> -> vector<96x26xf32>
    %c0_6 = arith.constant 0 : index
    %c0_7 = arith.constant 0 : index
    %11 = vector.load %arg4[%c0_6, %c0_7] : memref<80x128xf32, #tpu.memory_space<vmem>>, vector<1x26xf32>
    %12 = vector.broadcast %11 : vector<1x26xf32> to vector<96x26xf32>
    %13 = arith.addf %10, %12 : vector<96x26xf32>
    %c0_8 = arith.constant 0 : index
    %c0_9 = arith.constant 0 : index
    %14 = vector.load %arg3[%c0_8, %c0_9] : memref<160x128xbf16, #tpu.memory_space<vmem>>, vector<6x26xbf16>
    %15 = arith.truncf %1 : vector<16x6xf32> to vector<16x6xbf16>
    %cst_10 = arith.constant dense<0.000000e+00> : vector<16x26xf32>
    %16 = tpu.matmul %15, %14, %cst_10 {dimension_numbers = #tpu.dot_dimension_numbers<[1], [0], [0], [1], [0, 0, 1, 1], [], []>} : vector<16x6xbf16>, vector<6x26xbf16>, vector<16x26xf32> -> vector<16x26xf32>
    %17 = vector.shape_cast %13 : vector<96x26xf32> to vector<6x16x26xf32>
    %18 = vector.shape_cast %16 : vector<16x26xf32> to vector<1x16x26xf32>
    %19 = vector.broadcast %18 : vector<1x16x26xf32> to vector<6x16x26xf32>
    %20 = arith.addf %17, %19 : vector<6x16x26xf32>
    %21 = arith.negf %20 : vector<6x16x26xf32>
    %22 = math.exp %21 : vector<6x16x26xf32>
    %cst_11 = arith.constant 1.000000e+00 : f32
    %23 = vector.broadcast %cst_11 : f32 to vector<6x16x26xf32>
    %24 = arith.addf %23, %22 : vector<6x16x26xf32>
    %25 = arith.divf %23, %24 : vector<6x16x26xf32>
    %26 = arith.mulf %20, %25 : vector<6x16x26xf32>
    %27 = vector.shape_cast %26 : vector<6x16x26xf32> to vector<96x26xf32>
    %c32 = arith.constant 32 : index
    %c0_12 = arith.constant 0 : index
    %28 = vector.load %arg3[%c32, %c0_12] : memref<160x128xbf16, #tpu.memory_space<vmem>>, vector<26x32xbf16>
    %29 = arith.truncf %27 : vector<96x26xf32> to vector<96x26xbf16>
    %cst_13 = arith.constant dense<0.000000e+00> : vector<96x32xf32>
    %30 = tpu.matmul %29, %28, %cst_13 {dimension_numbers = #tpu.dot_dimension_numbers<[1], [0], [0], [1], [0, 0, 1, 1], [], []>} : vector<96x26xbf16>, vector<26x32xbf16>, vector<96x32xf32> -> vector<96x32xf32>
    %c8 = arith.constant 8 : index
    %c0_14 = arith.constant 0 : index
    %31 = vector.load %arg4[%c8, %c0_14] : memref<80x128xf32, #tpu.memory_space<vmem>>, vector<1x32xf32>
    %32 = vector.broadcast %31 : vector<1x32xf32> to vector<96x32xf32>
    %33 = arith.addf %30, %32 : vector<96x32xf32>
    %34 = arith.negf %33 : vector<96x32xf32>
    %35 = math.exp %34 : vector<96x32xf32>
    %cst_15 = arith.constant 1.000000e+00 : f32
    %36 = vector.broadcast %cst_15 : f32 to vector<96x32xf32>
    %37 = arith.addf %36, %35 : vector<96x32xf32>
    %38 = arith.divf %36, %37 : vector<96x32xf32>
    %39 = arith.mulf %33, %38 : vector<96x32xf32>
    %c16_16 = arith.constant 16 : index
    %c0_17 = arith.constant 0 : index
    %40 = vector.load %arg4[%c16_16, %c0_17] : memref<80x128xf32, #tpu.memory_space<vmem>>, vector<1x32xf32>
    %41 = vector.broadcast %40 : vector<1x32xf32> to vector<96x32xf32>
    %42 = arith.mulf %39, %41 : vector<96x32xf32>
    %cst_18 = arith.constant dense<0.000000e+00> : vector<96xf32>
    %43 = vector.multi_reduction <add>, %42, %cst_18 [1] : vector<96x32xf32> to vector<96xf32>
    %44 = vector.shape_cast %43 : vector<96xf32> to vector<96x1xf32>
    %45 = vector.extract_strided_slice %7 {offsets = [0, 0], sizes = [1, 1], strides = [1, 1]} : vector<1x3xf32> to vector<1x1xf32>
    %46 = vector.broadcast %45 : vector<1x1xf32> to vector<96x1xf32>
    %47 = arith.addf %44, %46 : vector<96x1xf32>
    %48 = arith.negf %47 : vector<96x1xf32>
    %49 = math.exp %48 : vector<96x1xf32>
    %cst_19 = arith.constant 1.000000e+00 : f32
    %50 = vector.broadcast %cst_19 : f32 to vector<96x1xf32>
    %51 = arith.addf %50, %49 : vector<96x1xf32>
    %52 = arith.divf %50, %51 : vector<96x1xf32>
    %53 = vector.broadcast %52 : vector<96x1xf32> to vector<96x32xf32>
    %54 = arith.mulf %39, %53 : vector<96x32xf32>
    %c64 = arith.constant 64 : index
    %c0_20 = arith.constant 0 : index
    %55 = vector.load %arg3[%c64, %c0_20] : memref<160x128xbf16, #tpu.memory_space<vmem>>, vector<32x128xbf16>
    %56 = arith.truncf %54 : vector<96x32xf32> to vector<96x32xbf16>
    %cst_21 = arith.constant dense<0.000000e+00> : vector<96x128xf32>
    %57 = tpu.matmul %56, %55, %cst_21 {dimension_numbers = #tpu.dot_dimension_numbers<[1], [0], [0], [1], [0, 0, 1, 1], [], []>} : vector<96x32xbf16>, vector<32x128xbf16>, vector<96x128xf32> -> vector<96x128xf32>
    %c32_22 = arith.constant 32 : index
    %c0_23 = arith.constant 0 : index
    %58 = vector.load %arg4[%c32_22, %c0_23] : memref<80x128xf32, #tpu.memory_space<vmem>>, vector<1x128xf32>
    %59 = vector.broadcast %58 : vector<1x128xf32> to vector<96x128xf32>
    %60 = arith.addf %57, %59 : vector<96x128xf32>
    %61 = arith.negf %60 : vector<96x128xf32>
    %62 = math.exp %61 : vector<96x128xf32>
    %cst_24 = arith.constant 1.000000e+00 : f32
    %63 = vector.broadcast %cst_24 : f32 to vector<96x128xf32>
    %64 = arith.addf %63, %62 : vector<96x128xf32>
    %65 = arith.divf %63, %64 : vector<96x128xf32>
    %66 = arith.mulf %60, %65 : vector<96x128xf32>
    %c40 = arith.constant 40 : index
    %c0_25 = arith.constant 0 : index
    %67 = vector.load %arg4[%c40, %c0_25] : memref<80x128xf32, #tpu.memory_space<vmem>>, vector<1x128xf32>
    %68 = vector.broadcast %67 : vector<1x128xf32> to vector<96x128xf32>
    %69 = arith.mulf %66, %68 : vector<96x128xf32>
    %cst_26 = arith.constant dense<0.000000e+00> : vector<96xf32>
    %70 = vector.multi_reduction <add>, %69, %cst_26 [1] : vector<96x128xf32> to vector<96xf32>
    %71 = vector.shape_cast %70 : vector<96xf32> to vector<96x1xf32>
    %72 = vector.extract_strided_slice %7 {offsets = [0, 1], sizes = [1, 1], strides = [1, 1]} : vector<1x3xf32> to vector<1x1xf32>
    %73 = vector.broadcast %72 : vector<1x1xf32> to vector<96x1xf32>
    %74 = arith.addf %71, %73 : vector<96x1xf32>
    %cst_27 = arith.constant -1.000000e+00 : f32
    %cst_28 = arith.constant 1.000000e+00 : f32
    %75 = vector.broadcast %cst_27 : f32 to vector<96x1xf32>
    %76 = arith.maximumf %75, %74 : vector<96x1xf32>
    %77 = vector.broadcast %cst_28 : f32 to vector<96x1xf32>
    %78 = arith.minimumf %77, %76 : vector<96x1xf32>
    %79 = arith.mulf %6, %6 : vector<96x3xf32>
    %cst_29 = arith.constant dense<0.000000e+00> : vector<96xf32>
    %80 = vector.multi_reduction <add>, %79, %cst_29 [1] : vector<96x3xf32> to vector<96xf32>
    %81 = vector.shape_cast %80 : vector<96xf32> to vector<96x1xf32>
    %82 = math.sqrt %81 : vector<96x1xf32>
    %cst_30 = arith.constant 1.000000e+00 : f32
    %83 = vector.broadcast %cst_30 : f32 to vector<96x1xf32>
    %84 = arith.addf %82, %83 : vector<96x1xf32>
    %85 = tpu.reciprocal %84 {approx = true} : vector<96x1xf32> -> vector<96x1xf32>
    %86 = vector.broadcast %85 : vector<96x1xf32> to vector<96x3xf32>
    %87 = arith.mulf %6, %86 : vector<96x3xf32>
    %88 = vector.extract_strided_slice %7 {offsets = [0, 2], sizes = [1, 1], strides = [1, 1]} : vector<1x3xf32> to vector<1x1xf32>
    %89 = vector.broadcast %88 : vector<1x1xf32> to vector<96x3xf32>
    %90 = arith.mulf %87, %89 : vector<96x3xf32>
    %91 = vector.broadcast %78 : vector<96x1xf32> to vector<96x3xf32>
    %92 = arith.mulf %91, %90 : vector<96x3xf32>
    %93 = vector.shape_cast %92 : vector<96x3xf32> to vector<6x16x3xf32>
    %cst_31 = arith.constant dense<0.000000e+00> : vector<16x3xf32>
    %94 = vector.multi_reduction <add>, %93, %cst_31 [0] : vector<6x16x3xf32> to vector<16x3xf32>
    %95 = arith.addf %2, %94 : vector<16x3xf32>
    %96 = vector.shape_cast %54 : vector<96x32xf32> to vector<6x16x32xf32>
    %cst_32 = arith.constant dense<0.000000e+00> : vector<16x32xf32>
    %97 = vector.multi_reduction <add>, %96, %cst_32 [0] : vector<6x16x32xf32> to vector<16x32xf32>
    %cst_33 = arith.constant dense<0.000000e+00> : vector<16xf32>
    %98 = vector.multi_reduction <add>, %1, %cst_33 [1] : vector<16x6xf32> to vector<16xf32>
    %99 = vector.shape_cast %98 : vector<16xf32> to vector<16x1xf32>
    %cst_34 = arith.constant 6.000000e+00 : f32
    %100 = vector.broadcast %cst_34 : f32 to vector<16x1xf32>
    %101 = arith.divf %99, %100 : vector<16x1xf32>
    %102 = vector.broadcast %101 : vector<16x1xf32> to vector<16x6xf32>
    %103 = arith.subf %1, %102 : vector<16x6xf32>
    %104 = arith.mulf %103, %103 : vector<16x6xf32>
    %cst_35 = arith.constant dense<0.000000e+00> : vector<16xf32>
    %105 = vector.multi_reduction <add>, %104, %cst_35 [1] : vector<16x6xf32> to vector<16xf32>
    %106 = vector.shape_cast %105 : vector<16xf32> to vector<16x1xf32>
    %cst_36 = arith.constant 6.000000e+00 : f32
    %107 = vector.broadcast %cst_36 : f32 to vector<16x1xf32>
    %108 = arith.divf %106, %107 : vector<16x1xf32>
    %109 = vector.broadcast %101 : vector<16x1xf32> to vector<16x6xf32>
    %110 = arith.subf %1, %109 : vector<16x6xf32>
    %cst_37 = arith.constant 9.99999974E-6 : f32
    %111 = vector.broadcast %cst_37 : f32 to vector<16x1xf32>
    %112 = arith.addf %108, %111 : vector<16x1xf32>
    %113 = math.rsqrt %112 : vector<16x1xf32>
    %114 = vector.broadcast %113 : vector<16x1xf32> to vector<16x6xf32>
    %115 = arith.mulf %110, %114 : vector<16x6xf32>
    %c48 = arith.constant 48 : index
    %c0_38 = arith.constant 0 : index
    %116 = vector.load %arg4[%c48, %c0_38] : memref<80x128xf32, #tpu.memory_space<vmem>>, vector<1x6xf32>
    %117 = vector.broadcast %116 : vector<1x6xf32> to vector<16x6xf32>
    %118 = arith.mulf %115, %117 : vector<16x6xf32>
    %c56 = arith.constant 56 : index
    %c0_39 = arith.constant 0 : index
    %119 = vector.load %arg4[%c56, %c0_39] : memref<80x128xf32, #tpu.memory_space<vmem>>, vector<1x6xf32>
    %120 = vector.broadcast %119 : vector<1x6xf32> to vector<16x6xf32>
    %121 = arith.addf %118, %120 : vector<16x6xf32>
    %c96 = arith.constant 96 : index
    %c0_40 = arith.constant 0 : index
    %122 = vector.load %arg3[%c96, %c0_40] : memref<160x128xbf16, #tpu.memory_space<vmem>>, vector<6x12xbf16>
    %123 = arith.truncf %121 : vector<16x6xf32> to vector<16x6xbf16>
    %cst_41 = arith.constant dense<0.000000e+00> : vector<16x12xf32>
    %124 = tpu.matmul %123, %122, %cst_41 {dimension_numbers = #tpu.dot_dimension_numbers<[1], [0], [0], [1], [0, 0, 1, 1], [], []>} : vector<16x6xbf16>, vector<6x12xbf16>, vector<16x12xf32> -> vector<16x12xf32>
    %c112 = arith.constant 112 : index
    %c0_42 = arith.constant 0 : index
    %125 = vector.load %arg3[%c112, %c0_42] : memref<160x128xbf16, #tpu.memory_space<vmem>>, vector<32x12xbf16>
    %126 = arith.truncf %97 : vector<16x32xf32> to vector<16x32xbf16>
    %cst_43 = arith.constant dense<0.000000e+00> : vector<16x12xf32>
    %127 = tpu.matmul %126, %125, %cst_43 {dimension_numbers = #tpu.dot_dimension_numbers<[1], [0], [0], [1], [0, 0, 1, 1], [], []>} : vector<16x32xbf16>, vector<32x12xbf16>, vector<16x12xf32> -> vector<16x12xf32>
    %128 = arith.addf %124, %127 : vector<16x12xf32>
    %c64_44 = arith.constant 64 : index
    %c0_45 = arith.constant 0 : index
    %129 = vector.load %arg4[%c64_44, %c0_45] : memref<80x128xf32, #tpu.memory_space<vmem>>, vector<1x12xf32>
    %130 = vector.broadcast %129 : vector<1x12xf32> to vector<16x12xf32>
    %131 = arith.addf %128, %130 : vector<16x12xf32>
    %132 = arith.negf %131 : vector<16x12xf32>
    %133 = math.exp %132 : vector<16x12xf32>
    %cst_46 = arith.constant 1.000000e+00 : f32
    %134 = vector.broadcast %cst_46 : f32 to vector<16x12xf32>
    %135 = arith.addf %134, %133 : vector<16x12xf32>
    %136 = arith.divf %134, %135 : vector<16x12xf32>
    %137 = arith.mulf %131, %136 : vector<16x12xf32>
    %c144 = arith.constant 144 : index
    %c0_47 = arith.constant 0 : index
    %138 = vector.load %arg3[%c144, %c0_47] : memref<160x128xbf16, #tpu.memory_space<vmem>>, vector<12x6xbf16>
    %139 = arith.truncf %137 : vector<16x12xf32> to vector<16x12xbf16>
    %cst_48 = arith.constant dense<0.000000e+00> : vector<16x6xf32>
    %140 = tpu.matmul %139, %138, %cst_48 {dimension_numbers = #tpu.dot_dimension_numbers<[1], [0], [0], [1], [0, 0, 1, 1], [], []>} : vector<16x12xbf16>, vector<12x6xbf16>, vector<16x6xf32> -> vector<16x6xf32>
    %c72 = arith.constant 72 : index
    %c0_49 = arith.constant 0 : index
    %141 = vector.load %arg4[%c72, %c0_49] : memref<80x128xf32, #tpu.memory_space<vmem>>, vector<1x6xf32>
    %142 = vector.broadcast %141 : vector<1x6xf32> to vector<16x6xf32>
    %143 = arith.addf %140, %142 : vector<16x6xf32>
    %144 = arith.addf %143, %1 : vector<16x6xf32>
    %c0_50 = arith.constant 0 : index
    %c0_51 = arith.constant 0 : index
    %145 = vector.load %arg5[%c0_50, %c0_51] : memref<16x9xf32, #tpu.memory_space<vmem>>, vector<16x6xf32>
    tpu.vector_store %arg5[%c0_50, %c0_51], %144 {strides = array<i32>} : memref<16x9xf32, #tpu.memory_space<vmem>>, vector<16x6xf32>,
    %c0_52 = arith.constant 0 : index
    %c6 = arith.constant 6 : index
    %146 = vector.load %arg5[%c0_52, %c6] : memref<16x9xf32, #tpu.memory_space<vmem>>, vector<16x3xf32>
    tpu.vector_store %arg5[%c0_52, %c6], %95 {strides = array<i32>} : memref<16x9xf32, #tpu.memory_space<vmem>>, vector<16x3xf32>,
    return
  }
  func.func @transform_0(%arg0: i32) -> (i32, i32) {
    %c0_i32 = arith.constant 0 : i32
    %c0_i32_0 = arith.constant 0 : i32
    return %arg0, %c0_i32 : i32, i32
  }
  func.func @transform_1(%arg0: i32) -> (i32, i32, i32) {
    %c0_i32 = arith.constant 0 : i32
    %c0_i32_0 = arith.constant 0 : i32
    %c0_i32_1 = arith.constant 0 : i32
    return %c0_i32, %arg0, %c0_i32_0 : i32, i32, i32
  }
  func.func @transform_2(%arg0: i32) -> (i32, i32) {
    %c0_i32 = arith.constant 0 : i32
    %c0_i32_0 = arith.constant 0 : i32
    %c0_i32_1 = arith.constant 0 : i32
    return %c0_i32, %c0_i32_0 : i32, i32
  }
  func.func @transform_3(%arg0: i32) -> (i32, i32) {
    %c0_i32 = arith.constant 0 : i32
    %c0_i32_0 = arith.constant 0 : i32
    %c0_i32_1 = arith.constant 0 : i32
    return %c0_i32, %c0_i32_0 : i32, i32
  }
  func.func @transform_4(%arg0: i32) -> (i32, i32) {
    %c0_i32 = arith.constant 0 : i32
    %c0_i32_0 = arith.constant 0 : i32
    return %arg0, %c0_i32 : i32, i32
  }
}

</mosaic_0001>

<bundles_post_ra>
// kernel: arnet_forward.1
= control target key start
LH: loop header
LB: loop body
LE: loop exit
PB: predicated region body
PF: predicated region fallthrough
CT: control target
= control target key end

     0   :  { %vm64_vm0 = vcmask 1042432   ;;  %vm65_vm1 = vcmask 1043456   ;;  %v2112_v0 = vmov 0.0   ;;  %v2113_v3 = vmov 65535   ;;  %s2116_s15 = smov 121   ;;  %s2118_s5 = smov 126   ;;  %s2860_s2 = inlined_call_operand.vmem [shape: bf16[160,128], index: 2, kind: input, shape index: {}]   ;;  %s2861_s0 = inlined_call_operand.vmem [shape: f32[16,9], index: 0, kind: input, shape index: {}]   ;;  %s2862_s1 = inlined_call_operand.vmem [shape: f32[6,16,10], index: 1, kind: input, shape index: {}]   ;;  %s2863_s3 = inlined_call_operand.vmem [shape: f32[80,128], index: 3, kind: input, shape index: {}]   ;;  %s2864_s4 = inlined_call_operand.vmem [shape: f32[16,9], index: 4, kind: output, shape index: {}]  }
   0x1   :  { %1766 = vmatprep.subr.bf16.mxu1 %v2112_v0  ;;  %v152_v1 = vld [vmem:[%s2860_s2] sm:$0x7]  ;;  %v33_v2 = vld [vmem:[%s2860_s2 + $0x8] sm:$0xf]  ;;  %v66_v4 = vsel %vm64_vm0, 4294967295, %v2113_v3  ;;  %vm2114_vm2 = vmmov 0  }
   0x2   :  { %v159_v5 = vsel %vm64_vm0, %v152_v1, 0  ;;  %v67_v6 = vsel %vm65_vm1, %v66_v4, 0  ;;  %1768 = vmatprep.mubr.msk.bf16.mxu1 %vm2114_vm2, %v2112_v0  ;;  %v2159_v7 = vld [vmem:[%s2861_s0] sm:$0xff]  ;;  %v2164_v8 = vld [vmem:[%s2861_s0 + $0x8] sm:$0xff]  ;;  %vm154_vm3 = vcmask 48128   ;;  %v2181_v13 = vld [vmem:[%s2862_s1 + $0x10] sm:$0xff] }
   0x3   :  { %v2169_v9 = vld [vmem:[%s2862_s1] sm:$0xff]  ;;  %1767 = vmatpush3.bf16.msra.mxu1 %v159_v5  ;;  %v69_v10 = vand.u32 %v67_v6, %v33_v2  ;;  %v153_v11 = vpack.c.bf16 %v2164_v8, %v2159_v7  ;;  %v2176_v12 = vld [vmem:[%s2862_s1 + $0x8] sm:$0xff]  ;;  %v2186_v14 = vld [vmem:[%s2862_s1 + $0x18] sm:$0xff]  ;;  %vm45_vm4 = vcmask 56320   ;;  %vm343_vm5 = vcmask 1044480  }
   0x4   :  { %v34_v15 = vpack.c.bf16 %v2176_v12, %v2169_v9  ;;  %v2193_v16 = vld [vmem:[%s2862_s1 + $0x20] sm:$0xff]  ;;  %v2198_v17 = vld [vmem:[%s2862_s1 + $0x28] sm:$0xff]  ;;  %v35_v18 = vpack.c.bf16 %v2186_v14, %v2181_v13  ;;  %v2209_v20 = vld [vmem:[%s2862_s1 + $0x30] sm:$0xff]  ;;  %vm324_vm6 = vcmask 211968   ;;  %vm529_vm7 = vcmask 261120  }
   0x5   :  { %1752 = vmatprep.subr.bf16.mxu0 %v69_v10  ;;  %v36_v19 = vpack.c.bf16 %v2198_v17, %v2193_v16  ;;  %v2214_v21 = vld [vmem:[%s2862_s1 + $0x38] sm:$0xff]  ;;  %v2221_v22 = vld [vmem:[%s2862_s1 + $0x40] sm:$0xff]  ;;  %v2226_v23 = vld [vmem:[%s2862_s1 + $0x48] sm:$0xff]  ;;  %vm1564_vm8 = vcmask 1045504   ;;  %vm1073_vm9 = vcmask 23552   ;;  %vm1560_vm10 = vcmask 97280  }
   0x6   :  { %1753 = vmatpush3.bf16.msra.mxu0 %v69_v10  ;;  %1769 = vmatmul.mubr.msk.bf16.vlgmr.msra.gmra.mxu1 %vm154_vm3, %v153_v11  ;;  %v37_v24 = vpack.c.bf16 %v2214_v21, %v2209_v20  ;;  %v38_v25 = vpack.c.bf16 %v2226_v23, %v2221_v22  ;;  %v2237_v26 = vld [vmem:[%s2862_s1 + $0x50] sm:$0xff]  ;;  %v31_v27 = vld [vmem:[%s2862_s1 + $0x58] sm:$0xff]  ;;  %v1620_v33 = vld [vmem:[%s2863_s3] ss:$0 sm:$0xff] }
   0x7   :  { %1754 = vmatprep.mubr.msk.bf16.mxu0 %vm45_vm4, %v34_v15  ;;  %v39_v28 = vpack.c.bf16 %v31_v27, %v2237_v26  ;;  %v1839_v29 = vld [vmem:[%s2860_s2 + $0x18] sm:$0x1f]   ;;  %v1840_v31 = vld [vmem:[%s2860_s2 + $0x10] sm:$0xff]  }
   0x8   :  { %1824 = vmatprep.subr.msk.bf16.mxu1 %vm343_vm5, %v1839_v29  ;;  %v345_v30 = vsel %vm343_vm5, %v1839_v29, 0 }
   0x9   :  { %1755 = vmatmul.mubr.msk.bf16.vlgmr.msra.gmra.mxu0 %vm45_vm4, %v35_v18  ;;  %1773 = vmatpush3.bf16.msra.mxu1 %v345_v30 }
   0xa   :  { %1758 = vmatprep.mubr.msk.bf16.mxu0 %vm45_vm4, %v36_v19  ;;  %1774 = vmatprep.subr.bf16.mxu1 %v1840_v31 }
   0xd   :  { %1775 = vmatpush3.bf16.msra.mxu1 %v1840_v31 }
   0xe   :  { %1804 = vmatprep.subr.bf16.mxu1 %v2112_v0 }
  0x11   :  { %1759 = vmatmul.mubr.msk.bf16.gmra.mxu0 %vm45_vm4, %v37_v24 }
  0x12   :  { %1762 = vmatprep.mubr.msk.bf16.mxu0 %vm45_vm4, %v38_v25 }
  0x19   :  { %1763 = vmatmul.mubr.msk.bf16.gmra.mxu0 %vm45_vm4, %v39_v28 }
  0xc6   :  { %v195_v32 = vpop.f32.mrf.mxu1 }
  0xc8   :  { %v1770_v34 = vpop.f32.mrf.mxu1 }
  0xc9   :  { %v1756_v35 = vpop.f32.mrf.mxu0 }
  0xca   :  { %v114_v36 = vadd.f32 %v1756_v35, %v1620_v33  ;;  %v198_v37 = vpop.f32.mrf.mxu1 }
  0xcb   :  { %v105_v38 = vpop.f32.mrf.mxu0 }
  0xcc   :  { %v2254_v39 = vadd.f32 %v195_v32, %v114_v36  ;;  %v106_v40 = vadd.f32 %v1620_v33, %v105_v38  ;;  %v1771_v41 = vpop.f32.mrf.mxu1 }
  0xcd   :  { %v1757_v42 = vpop.f32.mrf.mxu0 }
  0xce   :  { %v1630_v43 = vmul.f32 -1.442695, %v2254_v39  ;;  %v2257_v44 = vadd.f32 %v195_v32, %v106_v40  ;;  %v117_v45 = vadd.f32 %v1757_v42, %v1620_v33 }
  0xcf   :  { %v108_v46 = vpop.f32.mrf.mxu0 }
  0xd0   :  { %1846 = vpow2.f32 %v1630_v43  ;;  %v1628_v47 = vmul.f32 -1.442695, %v2257_v44  ;;  %v2260_v48 = vadd.f32 %v198_v37, %v117_v45  ;;  %v109_v49 = vadd.f32 %v1620_v33, %v108_v46 }
  0xd1   :  { %v1760_v50 = vpop.f32.mrf.mxu0 }
  0xd2   :  { %1848 = vpow2.f32 %v1628_v47  ;;  %v1631_v51 = vmul.f32 -1.442695, %v2260_v48  ;;  %v2263_v52 = vadd.f32 %v198_v37, %v109_v49  ;;  %v130_v53 = vadd.f32 %v1760_v50, %v1620_v33 }
  0xd3   :  { %v121_v54 = vpop.f32.mrf.mxu0 }
  0xd4   :  { %1850 = vpow2.f32 %v1631_v51  ;;  %v1629_v55 = vmul.f32 -1.442695, %v2263_v52  ;;  %v2266_v56 = vadd.f32 %v195_v32, %v130_v53  ;;  %v122_v57 = vadd.f32 %v1620_v33, %v121_v54 }
  0xd5   :  { %v1761_v58 = vpop.f32.mrf.mxu0 }
  0xd6   :  { %1852 = vpow2.f32 %v1629_v55  ;;  %v1634_v59 = vmul.f32 -1.442695, %v2266_v56  ;;  %v2269_v60 = vadd.f32 %v195_v32, %v122_v57  ;;  %v133_v61 = vadd.f32 %v1761_v58, %v1620_v33 }
  0xd7   :  { %v124_v62 = vpop.f32.mrf.mxu0 }
  0xd8   :  { %v1632_v63 = vmul.f32 -1.442695, %v2269_v60  ;;  %v2272_v1 = vadd.f32 %v198_v37, %v133_v61  ;;  %v125_v2 = vadd.f32 %v1620_v33, %v124_v62  ;;  %1854 = vpow2.f32 %v1634_v59 }
  0xd9   :  { %v1764_v3 = vpop.f32.mrf.mxu0 }
  0xda   :  { %1856 = vpow2.f32 %v1632_v63  ;;  %v1635_v4 = vmul.f32 -1.442695, %v2272_v1  ;;  %v2275_v5 = vadd.f32 %v198_v37, %v125_v2  ;;  %v146_v6 = vadd.f32 %v1764_v3, %v1620_v33 }
  0xdb   :  { %v137_v10 = vpop.f32.mrf.mxu0 }
  0xdc   :  { %1858 = vpow2.f32 %v1635_v4  ;;  %v1633_v11 = vmul.f32 -1.442695, %v2275_v5  ;;  %v2278_v15 = vadd.f32 %v195_v32, %v146_v6  ;;  %v138_v18 = vadd.f32 %v1620_v33, %v137_v10 }
  0xdd   :  { %v1847_v19 = vpop.eup %1846  ;;  %v1765_v24 = vpop.f32.mrf.mxu0 }
  0xde   :  { %v252_v25 = vadd.f32 1.0, %v1847_v19  ;;  %1860 = vpow2.f32 %v1633_v11  ;;  %v1638_v27 = vmul.f32 -1.442695, %v2278_v15  ;;  %v2281_v28 = vadd.f32 %v195_v32, %v138_v18 }
  0xdf   :  { %v1849_v29 = vpop.eup %1848  ;;  %v149_v30 = vadd.f32 %v1765_v24, %v1620_v33  ;;  %v140_v31 = vpop.f32.mrf.mxu0 }
  0xe0   :  { %1862 = vrcp.f32 %v252_v25  ;;  %v250_v34 = vadd.f32 1.0, %v1849_v29  ;;  %v1636_v35 = vmul.f32 -1.442695, %v2281_v28  ;;  %v141_v36 = vadd.f32 %v1620_v33, %v140_v31 }
  0xe1   :  { %v1851_v38 = vpop.eup %1850  ;;  %1864 = vpow2.f32 %v1638_v27  ;;  %v2284_v40 = vadd.f32 %v198_v37, %v149_v30 }
  0xe2   :  { %1866 = vrcp.f32 %v250_v34  ;;  %v253_v41 = vadd.f32 1.0, %v1851_v38  ;;  %v2286_v42 = vadd.f32 %v198_v37, %v141_v36 }
  0xe3   :  { %v1853_v43 = vpop.eup %1852  ;;  %1868 = vpow2.f32 %v1636_v35  ;;  %v1639_v32 = vmul.f32 -1.442695, %v2284_v40 }
  0xe4   :  { %1870 = vrcp.f32 %v253_v41  ;;  %v251_v45 = vadd.f32 1.0, %v1853_v43  ;;  %v1637_v46 = vmul.f32 -1.442695, %v2286_v42 }
  0xe5   :  { %1872 = vpow2.f32 %v1639_v32  ;;  %v1855_v47 = vpop.eup %1854 }
  0xe6   :  { %1874 = vrcp.f32 %v251_v45  ;;  %v256_v51 = vadd.f32 1.0, %v1855_v47  ;;  %v1640_v47 = vld [vmem:[%s2863_s3 + $0x8] ss:$0 sm:$0xff] }
  0xe7   :  { %v1857_v33 = vpop.eup %1856  ;;  %1876 = vpow2.f32 %v1637_v46 }
  0xe8   :  { %v254_v49 = vadd.f32 1.0, %v1857_v33 }
  0xe9   :  { %v1859_v50 = vpop.eup %1858 }
  0xea   :  { %v257_v53 = vadd.f32 1.0, %v1859_v50  ;;  %1878 = vrcp.f32 %v254_v49 }
  0xeb   :  { %v1861_v54 = vpop.eup %1860 }
  0xec   :  { %1880 = vrcp.f32 %v257_v53  ;;  %v255_v37 = vadd.f32 1.0, %v1861_v54 }
  0xed   :  { %v1863_v55 = vpop.eup %1862  ;;  %1882 = vrcp.f32 %v256_v51 }
  0xee   :  { %v1865_v57 = vpop.eup %1864  ;;  %1884 = vrcp.f32 %v255_v37  ;;  %v288_v19 = vmul.f32 %v1863_v55, %v2254_v39 }
  0xef   :  { %v1867_v58 = vpop.eup %1866  ;;  %v260_v2 = vadd.f32 1.0, %v1865_v57 }
  0xf0   :  { %v1869_v59 = vpop.eup %1868  ;;  %v286_v11 = vmul.f32 %v1867_v58, %v2257_v44 }
  0xf1   :  { %v1871_v61 = vpop.eup %1870  ;;  %v258_v62 = vadd.f32 1.0, %v1869_v59 }
  0xf2   :  { %v1873_v63 = vpop.eup %1872  ;;  %v289_v4 = vmul.f32 %v1871_v61, %v2260_v48 }
  0xf3   :  { %v1875_v3 = vpop.eup %1874  ;;  %v261_v6 = vadd.f32 1.0, %v1873_v63  ;;  %1886 = vrcp.f32 %v258_v62 }
  0xf4   :  { %v1877_v10 = vpop.eup %1876  ;;  %v287_v18 = vmul.f32 %v1875_v3, %v2263_v52  ;;  %v303_v27 = vpack.c.bf16 %v289_v4, %v288_v19 }
  0xf5   :  { %1888 = vrcp.f32 %v261_v6  ;;  %v259_v24 = vadd.f32 1.0, %v1877_v10 }
  0xf6   :  { %v302_v25 = vpack.c.bf16 %v287_v18, %v286_v11  ;;  %1890 = vrcp.f32 %v260_v2 }
  0xf7   :  { %1892 = vrcp.f32 %v259_v24  ;;  %v1879_v29 = vpop.eup %1878 }
  0xf8   :  { %1776 = vmatprep.mubr.msk.bf16.mxu1 %vm324_vm6, %v302_v25  ;;  %v290_v31 = vmul.f32 %v1879_v29, %v2269_v60 }
  0xf9   :  { %v1881_v48 = vpop.eup %1880  ;;  %1777 = vmatmul.mubr.msk.bf16.vlgmr.msra.gmra.mxu1 %vm324_vm6, %v303_v27 }
  0xfa   :  { %v1883_v30 = vpop.eup %1882  ;;  %v293_v52 = vmul.f32 %v1881_v48, %v2272_v1 }
  0xfb   :  { %v1885_v44 = vpop.eup %1884  ;;  %v292_v34 = vmul.f32 %v1883_v30, %v2266_v56 }
  0xfc   :  { %v291_v39 = vmul.f32 %v1885_v44, %v2275_v5 }
  0xfd   :  { %v305_v36 = vpack.c.bf16 %v293_v52, %v292_v34 }
  0xfe   :  { %v304_v35 = vpack.c.bf16 %v291_v39, %v290_v31 }
 0x100   :  { %1780 = vmatprep.mubr.msk.bf16.mxu1 %vm324_vm6, %v304_v35  ;;  %v1887_v38 = vpop.eup %1886 }
 0x101   :  { %1781 = vmatmul.mubr.msk.bf16.gmra.mxu1 %vm324_vm6, %v305_v36  ;;  %v294_v1 = vmul.f32 %v1887_v38, %v2281_v28 }
 0x102   :  { %v1889_v41 = vpop.eup %1888 }
 0x103   :  { %v1891_v43 = vpop.eup %1890  ;;  %v297_v45 = vmul.f32 %v1889_v41, %v2284_v40 }
 0x104   :  { %v1893_v32 = vpop.eup %1892  ;;  %v296_v5 = vmul.f32 %v1891_v43, %v2278_v15 }
 0x105   :  { %v295_v60 = vmul.f32 %v1893_v32, %v2286_v42 }
 0x106   :  { %v307_v56 = vpack.c.bf16 %v297_v45, %v296_v5 }
 0x107   :  { %v306_v46 = vpack.c.bf16 %v295_v60, %v294_v1 }
 0x109   :  { %1784 = vmatprep.mubr.msk.bf16.mxu1 %vm324_vm6, %v306_v46 }
 0x10a   :  { %1785 = vmatmul.mubr.msk.bf16.gmra.mxu1 %vm324_vm6, %v307_v56 }
 0x10b   :  { %1808 = vmatprep.mubr.msk.bf16.mxu1 %vm2114_vm2, %v2112_v0 }
 0x1b9   :  { %v1778_v40 = vpop.f32.mrf.mxu1 }
 0x1ba   :  { %v2313_v33 = vadd.f32 %v1778_v40, %v1640_v47 }
 0x1bb   :  { %v381_v28 = vpop.f32.mrf.mxu1 }
 0x1bc   :  { %v1651_v42 = vmul.f32 -1.442695, %v2313_v33  ;;  %v2316_v15 = vadd.f32 %v1640_v47, %v381_v28 }
 0x1bd   :  { %v1779_v49 = vpop.f32.mrf.mxu1 }
 0x1be   :  { %1894 = vpow2.f32 %v1651_v42  ;;  %v1649_v50 = vmul.f32 -1.442695, %v2316_v15  ;;  %v2319_v51 = vadd.f32 %v1779_v49, %v1640_v47  ;;  %v2352_v49 = vld [vmem:[%s2863_s3 + $0x10] ss:$0 sm:$0xff] }
 0x1bf   :  { %v384_v53 = vpop.f32.mrf.mxu1 }
 0x1c0   :  { %1896 = vpow2.f32 %v1649_v50  ;;  %v1652_v54 = vmul.f32 -1.442695, %v2319_v51  ;;  %v2322_v37 = vadd.f32 %v1640_v47, %v384_v53 }
 0x1c1   :  { %v1782_v55 = vpop.f32.mrf.mxu1 }
 0x1c2   :  { %1898 = vpow2.f32 %v1652_v54  ;;  %v1650_v57 = vmul.f32 -1.442695, %v2322_v37  ;;  %v2325_v58 = vadd.f32 %v1782_v55, %v1640_v47 }
 0x1c3   :  { %v397_v59 = vpop.f32.mrf.mxu1 }
 0x1c4   :  { %1900 = vpow2.f32 %v1650_v57  ;;  %v1655_v61 = vmul.f32 -1.442695, %v2325_v58  ;;  %v2328_v62 = vadd.f32 %v1640_v47, %v397_v59 }
 0x1c5   :  { %v1783_v63 = vpop.f32.mrf.mxu1 }
 0x1c6   :  { %1902 = vpow2.f32 %v1655_v61  ;;  %v1653_v2 = vmul.f32 -1.442695, %v2328_v62  ;;  %v2331_v3 = vadd.f32 %v1783_v63, %v1640_v47 }
 0x1c7   :  { %v400_v4 = vpop.f32.mrf.mxu1 }
 0x1c8   :  { %1904 = vpow2.f32 %v1653_v2  ;;  %v1656_v6 = vmul.f32 -1.442695, %v2331_v3  ;;  %v2334_v10 = vadd.f32 %v1640_v47, %v400_v4 }
 0x1ca   :  { %1906 = vpow2.f32 %v1656_v6  ;;  %v1654_v11 = vmul.f32 -1.442695, %v2334_v10  ;;  %v1786_v18 = vpop.f32.mrf.mxu1 }
 0x1cb   :  { %v1895_v19 = vpop.eup %1894  ;;  %v2337_v24 = vadd.f32 %v1786_v18, %v1640_v47 }
 0x1cc   :  { %v466_v25 = vadd.f32 1.0, %v1895_v19  ;;  %1908 = vpow2.f32 %v1654_v11  ;;  %v413_v27 = vpop.f32.mrf.mxu1 }
 0x1cd   :  { %v1897_v29 = vpop.eup %1896  ;;  %v1659_v48 = vmul.f32 -1.442695, %v2337_v24  ;;  %v2340_v30 = vadd.f32 %v1640_v47, %v413_v27 }
 0x1ce   :  { %1910 = vrcp.f32 %v466_v25  ;;  %v464_v44 = vadd.f32 1.0, %v1897_v29  ;;  %v1787_v52 = vpop.f32.mrf.mxu1 }
 0x1cf   :  { %v1899_v31 = vpop.eup %1898  ;;  %1912 = vpow2.f32 %v1659_v48  ;;  %v1657_v39 = vmul.f32 -1.442695, %v2340_v30  ;;  %v2343_v34 = vadd.f32 %v1787_v52, %v1640_v47 }
 0x1d0   :  { %1914 = vrcp.f32 %v464_v44  ;;  %v467_v35 = vadd.f32 1.0, %v1899_v31  ;;  %v416_v36 = vpop.f32.mrf.mxu1 }
 0x1d1   :  { %v1901_v38 = vpop.eup %1900  ;;  %1916 = vpow2.f32 %v1657_v39  ;;  %v1660_v41 = vmul.f32 -1.442695, %v2343_v34  ;;  %v2346_v43 = vadd.f32 %v1640_v47, %v416_v36 }
 0x1d2   :  { %1918 = vrcp.f32 %v467_v35  ;;  %v465_v32 = vadd.f32 1.0, %v1901_v38 }
 0x1d3   :  { %v1903_v45 = vpop.eup %1902  ;;  %1920 = vpow2.f32 %v1660_v41  ;;  %v1658_v1 = vmul.f32 -1.442695, %v2346_v43 }
 0x1d4   :  { %1922 = vrcp.f32 %v465_v32  ;;  %v470_v60 = vadd.f32 1.0, %v1903_v45 }
 0x1d5   :  { %v1905_v5 = vpop.eup %1904  ;;  %1924 = vpow2.f32 %v1658_v1 }
 0x1d6   :  { %1926 = vrcp.f32 %v470_v60  ;;  %v468_v46 = vadd.f32 1.0, %v1905_v5 }
 0x1d7   :  { %v1907_v56 = vpop.eup %1906 }
 0x1d8   :  { %1928 = vrcp.f32 %v468_v46  ;;  %v471_v40 = vadd.f32 1.0, %v1907_v56 }
 0x1d9   :  { %v1909_v28 = vpop.eup %1908 }
 0x1da   :  { %1930 = vrcp.f32 %v471_v40  ;;  %v469_v42 = vadd.f32 1.0, %v1909_v28 }
 0x1db   :  { %v1911_v47 = vpop.eup %1910 }
 0x1dc   :  { %v1913_v50 = vpop.eup %1912  ;;  %v2355_v53 = vmul.f32 %v1911_v47, %v2313_v33  ;;  %1932 = vrcp.f32 %v469_v42 }
 0x1dd   :  { %v1915_v54 = vpop.eup %1914  ;;  %v474_v55 = vadd.f32 1.0, %v1913_v50 }
 0x1de   :  { %v1917_v57 = vpop.eup %1916  ;;  %v2358_v59 = vmul.f32 %v1915_v54, %v2316_v15  ;;  %v519_v61 = vmul.f32 %v2352_v49, %v2355_v53 }
 0x1df   :  { %v1919_v63 = vpop.eup %1918  ;;  %1934 = vrcp.f32 %v474_v55  ;;  %v472_v2 = vadd.f32 1.0, %v1917_v57 }
 0x1e0   :  { %v1921_v4 = vpop.eup %1920  ;;  %v2363_v6 = vmul.f32 %v1919_v63, %v2319_v51  ;;  %v536_v33 = vsel %vm529_vm7, %v519_v61, 0.0  ;;  %v517_v11 = vmul.f32 %v2352_v49, %v2358_v59 }
 0x1e1   :  { %v1923_v18 = vpop.eup %1922  ;;  %1936 = vrcp.f32 %v472_v2  ;;  %v475_v19 = vadd.f32 1.0, %v1921_v4  ;;  %537 = vadd.xlane.f32.xlu1 %v536_v33  ;;  %v1378_v4 = vsel %vm154_vm3, %v2164_v8, 0.0  ;;  %v2115_v33 = vmov 0  }
 0x1e2   :  { %v1925_v15 = vpop.eup %1924  ;;  %v2369_v25 = vmul.f32 %v1923_v18, %v2322_v37  ;;  %v530_v27 = vsel %vm529_vm7, %v517_v11, 0.0  ;;  %v520_v29 = vmul.f32 %v2352_v49, %v2363_v6  ;;  %1835 = vset.pattern.permute.xlu1 %v2115_v33  ;;  %1836 = vset.pattern.permute.xlu0 %v2115_v33  ;;  %v566_v11 = vlaneseq }
 0x1e3   :  { %v1927_v51 = vpop.eup %1926  ;;  %1938 = vrcp.f32 %v475_v19  ;;  %v473_v48 = vadd.f32 1.0, %v1925_v15  ;;  %531 = vadd.xlane.f32.xlu0 %v530_v27 }
 0x1e4   :  { %v2375_v44 = vmul.f32 %v1927_v51, %v2325_v58  ;;  %v539_v52 = vsel %vm529_vm7, %v520_v29, 0.0  ;;  %v518_v31 = vmul.f32 %v2352_v49, %v2369_v25  ;;  %v567_v18 = vshrl.u32 %v566_v11, 7  ;;  %v2433_v29 = vld [vmem:[%s2863_s3 + $0x18] sm:$0x1] }
 0x1e5   :  { %v1929_v39 = vpop.eup %1928  ;;  %1940 = vrcp.f32 %v473_v48  ;;  %540 = vadd.xlane.f32.xlu1 %v539_v52 }
 0x1e6   :  { %v2381_v37 = vmul.f32 %v1929_v39, %v2328_v62  ;;  %v533_v35 = vsel %vm529_vm7, %v518_v31, 0.0  ;;  %v523_v36 = vmul.f32 %v2352_v49, %v2375_v44  ;;  %v568_v15 = vsub.s32 0, %v567_v18 }
 0x1e7   :  { %v1931_v38 = vpop.eup %1930  ;;  %534 = vadd.xlane.f32.xlu0 %v533_v35 }
 0x1e8   :  { %v2387_v58 = vmul.f32 %v1931_v38, %v2331_v3  ;;  %v548_v45 = vsel %vm529_vm7, %v523_v36, 0.0  ;;  %v521_v1 = vmul.f32 %v2352_v49, %v2381_v37  ;;  %v2436_v48 = vrot.slane %v2433_v29, %v568_v15 }
 0x1e9   :  { %v1933_v41 = vpop.eup %1932 }
 0x1ea   :  { %v2390_v32 = vmul.f32 %v1933_v41, %v2334_v10  ;;  %v524_v62 = vmul.f32 %v2352_v49, %v2387_v58  ;;  %v542_v10 = vsel %vm529_vm7, %v521_v1, 0.0 }
 0x1eb   :  { %549 = vadd.xlane.f32.xlu0 %v548_v45 }
 0x1ec   :  { %v1935_v60 = vpop.eup %1934  ;;  %v551_v5 = vsel %vm529_vm7, %v524_v62, 0.0  ;;  %v522_v3 = vmul.f32 %v2352_v49, %v2390_v32 }
 0x1ed   :  { %552 = vadd.xlane.f32.xlu1 %v551_v5  ;;  %v2402_v56 = vmul.f32 %v1935_v60, %v2337_v24 }
 0x1ee   :  { %v1937_v46 = vpop.eup %1936  ;;  %v545_v42 = vsel %vm529_vm7, %v522_v3, 0.0 }
 0x1ef   :  { %v2405_v40 = vmul.f32 %v1937_v46, %v2340_v30  ;;  %543 = vadd.xlane.f32.xlu0 %v542_v10  ;;  %v527_v30 = vmul.f32 %v2352_v49, %v2402_v56 }
 0x1f0   :  { %v1939_v28 = vpop.eup %1938 }
 0x1f1   :  { %546 = vadd.xlane.f32.xlu1 %v545_v42  ;;  %v525_v47 = vmul.f32 %v2352_v49, %v2405_v40  ;;  %v2411_v54 = vmul.f32 %v1939_v28, %v2343_v34  ;;  %v560_v63 = vsel %vm529_vm7, %v527_v30, 0.0 }
 0x1f2   :  { %v1941_v50 = vpop.eup %1940 }
 0x1f3   :  { %v2414_v55 = vmul.f32 %v1941_v50, %v2346_v43  ;;  %v554_v24 = vsel %vm529_vm7, %v525_v47, 0.0  ;;  %v528_v34 = vmul.f32 %v2352_v49, %v2411_v54  ;;  %v1375_v43 = vsel %vm154_vm3, %v2159_v7, 0.0 }
 0x1f4   :  { %555 = vadd.xlane.f32.xlu0 %v554_v24 }
 0x1f5   :  { %v526_v57 = vmul.f32 %v2352_v49, %v2414_v55  ;;  %v563_v2 = vsel %vm529_vm7, %v528_v34, 0.0 }
 0x1f7   :  { %v557_v61 = vsel %vm529_vm7, %v526_v57, 0.0 }
 0x1f8   :  { %558 = vadd.xlane.f32.xlu1 %v557_v61  ;;  %561 = vadd.xlane.f32.xlu0 %v560_v63 }
 0x1fc   :  { %564 = vadd.xlane.f32.xlu1 %v563_v2  ;;  %1376 = vadd.xlane.f32.xlu0 %v1375_v43 }
 0x200   :  { %1379 = vadd.xlane.f32.xlu1 %v1378_v4 }
 0x26a   :  { %v538_v49 = vpop.xlane.xlu1 %537 }
 0x26b   :  { %v572_v39 = vadd.f32 %v2436_v48, %v538_v49 }
 0x26c   :  { %v532_v19 = vpop.xlane.xlu0 %531 }
 0x26d   :  { %v570_v36 = vadd.f32 %v2436_v48, %v532_v19  ;;  %v1664_v38 = vmul.f32 -1.442695, %v572_v39 }
 0x26e   :  { %v541_v51 = vpop.xlane.xlu1 %540 }
 0x26f   :  { %v573_v41 = vadd.f32 %v2436_v48, %v541_v51  ;;  %v1662_v45 = vmul.f32 -1.442695, %v570_v36  ;;  %1942 = vpow2.f32 %v1664_v38 }
 0x270   :  { %v535_v27 = vpop.xlane.xlu0 %534 }
 0x271   :  { %v571_v60 = vadd.f32 %v2436_v48, %v535_v27  ;;  %v1665_v5 = vmul.f32 -1.442695, %v573_v41  ;;  %1944 = vpow2.f32 %v1662_v45 }
 0x273   :  { %v1663_v28 = vmul.f32 -1.442695, %v571_v60  ;;  %1946 = vpow2.f32 %v1665_v5 }
 0x274   :  { %v550_v52 = vpop.xlane.xlu0 %549 }
 0x275   :  { %v576_v42 = vadd.f32 %v2436_v48, %v550_v52 }
 0x276   :  { %v553_v31 = vpop.xlane.xlu1 %552 }
 0x277   :  { %v1668_v61 = vmul.f32 -1.442695, %v576_v42  ;;  %v577_v11 = vadd.f32 %v2436_v48, %v553_v31 }
 0x278   :  { %v544_v35 = vpop.xlane.xlu0 %543 }
 0x279   :  { %v574_v63 = vadd.f32 %v2436_v48, %v544_v35  ;;  %v1669_v51 = vmul.f32 -1.442695, %v577_v11  ;;  %v1842_v11 = vld [vmem:[%s2860_s2 + $0x20] sm:$0xff]  }
 0x27a   :  { %v547_v62 = vpop.xlane.xlu1 %546 }
 0x27b   :  { %v1666_v18 = vmul.f32 -1.442695, %v574_v63  ;;  %v575_v52 = vadd.f32 %v2436_v48, %v547_v62 }
 0x27c   :  { %v1943_v15 = vpop.eup %1942 }
 0x27d   :  { %v556_v1 = vpop.xlane.xlu0 %555  ;;  %v620_v39 = vadd.f32 1.0, %v1943_v15  ;;  %v1667_v38 = vmul.f32 -1.442695, %v575_v52 }
 0x27e   :  { %v1945_v27 = vpop.eup %1944  ;;  %v578_v41 = vadd.f32 %v2436_v48, %v556_v1 }
 0x27f   :  { %v618_v36 = vadd.f32 1.0, %v1945_v27 }
 0x280   :  { %v1947_v35 = vpop.eup %1946  ;;  %v1670_v62 = vmul.f32 -1.442695, %v578_v41 }
 0x281   :  { %v559_v3 = vpop.xlane.xlu1 %558  ;;  %v562_v46 = vpop.xlane.xlu0 %561  ;;  %v621_v60 = vadd.f32 1.0, %v1947_v35 }
 0x282   :  { %v579_v10 = vadd.f32 %v2436_v48, %v559_v3 }
 0x284   :  { %v1671_v47 = vmul.f32 -1.442695, %v579_v10  ;;  %v580_v10 = vadd.f32 %v2436_v48, %v562_v46  ;;  %v1841_v46 = vld [vmem:[%s2860_s2 + $0x28] sm:$0xff]  }
 0x285   :  { %v565_v50 = vpop.xlane.xlu1 %564  ;;  %v1377_v24 = vpop.xlane.xlu0 %1376  ;;  %1788 = vmatprep.subr.bf16.mxu0 %v1841_v46 }
 0x286   :  { %1948 = vpow2.f32 %v1671_v47  ;;  %v581_v30 = vadd.f32 %v2436_v48, %v565_v50  ;;  %v1382_v57 = vmul.f32 0.16666667, %v1377_v24  ;;  %v1672_v50 = vmul.f32 -1.442695, %v580_v10  ;;  %1789 = vmatpush3.bf16.msra.mxu0 %v1841_v46 }
 0x287   :  { %1950 = vpow2.f32 %v1663_v28  ;;  %1790 = vmatprep.subr.bf16.mxu0 %v1842_v11  ;;  %v1019_v10 = vmul.f32 %v2209_v20, %v2209_v20 }
 0x288   :  { %v1673_v34 = vmul.f32 -1.442695, %v581_v30  ;;  %v2447_v43 = vsub.f32 %v2159_v7, %v1382_v57 }
 0x289   :  { %v1380_v2 = vpop.xlane.xlu1 %1379 }
 0x28a   :  { %1952 = vpow2.f32 %v1673_v34  ;;  %v1383_v4 = vmul.f32 0.16666667, %v1380_v2  ;;  %v1386_v33 = vmul.f32 %v2447_v43, %v2447_v43  ;;  %1791 = vmatpush3.bf16.msra.mxu0 %v1842_v11 }
 0x28b   :  { %1954 = vpow2.f32 %v1668_v61  ;;  %1818 = vmatprep.subr.bf16.mxu0 %v2112_v0 }
 0x28c   :  { %v2453_v19 = vsub.f32 %v2164_v8, %v1383_v4  ;;  %v1388_v49 = vsel %vm154_vm3, %v1386_v33, 0.0  ;;  %1956 = vpow2.f32 %v1666_v18 }
 0x28d   :  { %1389 = vadd.xlane.f32.xlu0 %v1388_v49  ;;  %1958 = vpow2.f32 %v1669_v51 }
 0x28e   :  { %v1387_v7 = vmul.f32 %v2453_v19, %v2453_v19  ;;  %1960 = vrcp.f32 %v620_v39 }
 0x28f   :  { %1962 = vrcp.f32 %v618_v36 }
 0x290   :  { %v1391_v31 = vsel %vm154_vm3, %v1387_v7, 0.0  ;;  %1964 = vpow2.f32 %v1667_v38  ;;  %v1843_v38 = vld [vmem:[%s2860_s2 + $0x40] sm:$0xff]  }
 0x291   :  { %1392 = vadd.xlane.f32.xlu1 %v1391_v31  ;;  %1966 = vrcp.f32 %v621_v60  ;;  %1805 = vmatpush3.bf16.msra.mxu1 %v1843_v38  ;;  %v1013_v60 = vmul.f32 %v2169_v9, %v2169_v9  ;;  %v1017_v9 = vmul.f32 %v2193_v16, %v2193_v16  ;;  %v1022_v16 = vmul.f32 %v2226_v23, %v2226_v23 }
 0x292   :  { %1806 = vmatprep.subr.bf16.mxu1 %v2112_v0 }
 0x293   :  { %v1949_v8 = vpop.eup %1948 }
 0x294   :  { %v1951_v45 = vpop.eup %1950  ;;  %v627_v5 = vadd.f32 1.0, %v1949_v8 }
 0x295   :  { %v619_v28 = vadd.f32 1.0, %v1951_v45  ;;  %v1844_v45 = vld [vmem:[%s2860_s2 + $0x38] sm:$0xff]  }
 0x296   :  { %1968 = vrcp.f32 %v627_v5  ;;  %1807 = vmatpush3.bf16.msra.mxu1 %v1844_v45  ;;  %v1014_v5 = vmul.f32 %v2176_v12, %v2176_v12  ;;  %v1018_v12 = vmul.f32 %v2198_v17, %v2198_v17  ;;  %v1023_v17 = vmul.f32 %v2237_v26, %v2237_v26 }
 0x297   :  { %v1953_v3 = vpop.eup %1952  ;;  %1970 = vpow2.f32 %v1670_v62  ;;  %1812 = vmatprep.subr.bf16.mxu1 %v2112_v0  ;;  %v1016_v62 = vmul.f32 %v2186_v14, %v2186_v14  ;;  %v1021_v14 = vmul.f32 %v2221_v22, %v2221_v22 }
 0x298   :  { %v1955_v42 = vpop.eup %1954  ;;  %v629_v47 = vadd.f32 1.0, %v1953_v3  ;;  %1972 = vrcp.f32 %v619_v28  ;;  %v1015_v3 = vmul.f32 %v2181_v13, %v2181_v13  ;;  %v1020_v13 = vmul.f32 %v2214_v21, %v2214_v21 }
 0x299   :  { %v624_v24 = vadd.f32 1.0, %v1955_v42  ;;  %v1957_v1 = vpop.eup %1956 }
 0x29a   :  { %1974 = vrcp.f32 %v629_v47  ;;  %v1959_v30 = vpop.eup %1958  ;;  %v622_v57 = vadd.f32 1.0, %v1957_v1 }
 0x29b   :  { %1976 = vpow2.f32 %v1672_v50  ;;  %v1961_v61 = vpop.eup %1960  ;;  %v625_v2 = vadd.f32 1.0, %v1959_v30 }
 0x29c   :  { %1978 = vrcp.f32 %v624_v24  ;;  %v1963_v63 = vpop.eup %1962 }
 0x29d   :  { %v1965_v34 = vpop.eup %1964  ;;  %1980 = vrcp.f32 %v622_v57 }
 0x29e   :  { %v1967_v4 = vpop.eup %1966  ;;  %1982 = vrcp.f32 %v625_v2  ;;  %v623_v49 = vadd.f32 1.0, %v1965_v34 }
 0x2a0   :  { %1984 = vrcp.f32 %v623_v49 }
 0x2a2   :  { %666 = vperm.xlu1 %1835, %v1961_v61  }
 0x2a3   :  { %656 = vperm.xlu0 %1836, %v1963_v63   ;;  %v1969_v33 = vpop.eup %1968 }
 0x2a4   :  { %v1971_v18 = vpop.eup %1970 }
 0x2a5   :  { %v1973_v15 = vpop.eup %1972  ;;  %v626_v51 = vadd.f32 1.0, %v1971_v18 }
 0x2a6   :  { %671 = vperm.xlu1 %1835, %v1967_v4  }
 0x2a7   :  { %701 = vperm.xlu0 %1836, %v1969_v33   ;;  %v1975_v27 = vpop.eup %1974  ;;  %1986 = vrcp.f32 %v626_v51 }
 0x2a8   :  { %v1977_v7 = vpop.eup %1976 }
 0x2a9   :  { %v1979_v52 = vpop.eup %1978  ;;  %v628_v39 = vadd.f32 1.0, %v1977_v7 }
 0x2aa   :  { %661 = vperm.xlu1 %1835, %v1973_v15   ;;  %v1981_v31 = vpop.eup %1980 }
 0x2ab   :  { %711 = vperm.xlu0 %1836, %v1975_v27   ;;  %1988 = vrcp.f32 %v628_v39  ;;  %v1983_v35 = vpop.eup %1982 }
 0x2ad   :  { %v1985_v36 = vpop.eup %1984 }
 0x2ae   :  { %686 = vperm.xlu1 %1835, %v1979_v52  }
 0x2af   :  { %1039 = vrot.lane.b32.xlu0 %v1014_v5, %s2116_s15 }
 0x2b2   :  { %676 = vperm.xlu1 %1835, %v1981_v31  }
 0x2b3   :  { %1043 = vrot.lane.b32.xlu0 %v1016_v62, %s2116_s15 }
 0x2b4   :  { %v1987_v8 = vpop.eup %1986 }
 0x2b6   :  { %691 = vperm.xlu1 %1835, %v1983_v35  }
 0x2b7   :  { %1047 = vrot.lane.b32.xlu0 %v1018_v12, %s2116_s15 }
 0x2b8   :  { %v1989_v41 = vpop.eup %1988 }
 0x2ba   :  { %681 = vperm.xlu1 %1835, %v1985_v36  }
 0x2bb   :  { %1051 = vrot.lane.b32.xlu0 %v1020_v13, %s2116_s15 }
 0x2be   :  { %696 = vperm.xlu1 %1835, %v1987_v8  }
 0x2bf   :  { %1055 = vrot.lane.b32.xlu0 %v1022_v16, %s2116_s15 }
 0x2c2   :  { %706 = vperm.xlu1 %1835, %v1989_v41  }
 0x2c6   :  { %1037 = vrot.lane.b32.xlu1 %v1013_v60, %s2116_s15 }
 0x2ca   :  { %1041 = vrot.lane.b32.xlu1 %v1015_v3, %s2116_s15 }
 0x2ce   :  { %1045 = vrot.lane.b32.xlu1 %v1017_v9, %s2116_s15 }
 0x2d2   :  { %1049 = vrot.lane.b32.xlu1 %v1019_v10, %s2116_s15 }
 0x2d6   :  { %1053 = vrot.lane.b32.xlu1 %v1021_v14, %s2116_s15 }
 0x2da   :  { %1057 = vrot.lane.b32.xlu1 %v1023_v17, %s2116_s15 }
 0x316   :  { %v1390_v28 = vpop.xlane.xlu0 %1389 }
 0x317   :  { %v1394_v61 = vmul.f32 0.16666667, %v1390_v28 }
 0x319   :  { %v1396_v34 = vadd.f32 1e-05, %v1394_v61 }
 0x31a   :  { %v1393_v20 = vpop.xlane.xlu1 %1392 }
 0x31b   :  { %v1395_v1 = vmul.f32 0.16666667, %v1393_v20 }
 0x31d   :  { %v1397_v46 = vadd.f32 1e-05, %v1395_v1 }
 0x31e   :  { %v667_v21 = vpop.permute.xlu1 %666  ;;  %v657_v47 = vpop.permute.xlu0 %656 }
 0x31f   :  { %v714_v24 = vmul.f32 %v657_v47, %v2358_v59  ;;  %v716_v30 = vmul.f32 %v667_v21, %v2355_v53  ;;  %1990 = vrsqrt.f32 %v1397_v46  ;;  %v1416_v21 = vld [vmem:[%s2860_s2 + $0x30] sm:$0x7] }
 0x320   :  { %1992 = vrsqrt.f32 %v1396_v34 }
 0x321   :  { %v1354_v4 = vsel %vm529_vm7, %v716_v30, 0.0  ;;  %v1353_v53 = vsel %vm529_vm7, %v714_v24, 0.0 }
 0x322   :  { %v672_v42 = vpop.permute.xlu1 %671  ;;  %v1355_v7 = vadd.f32 %v1354_v4, %v1353_v53 }
 0x323   :  { %v717_v50 = vmul.f32 %v672_v42, %v2363_v6 }
 0x325   :  { %v731_v26 = vpack.c.bf16 %v717_v50, %v716_v30  ;;  %v1365_v49 = vsel %vm529_vm7, %v717_v50, 0.0 }
 0x326   :  { %v662_v22 = vpop.permute.xlu1 %661 }
 0x327   :  { %v715_v23 = vmul.f32 %v662_v22, %v2369_v25  ;;  %v702_v25 = vpop.permute.xlu0 %701 }
 0x328   :  { %v723_v51 = vmul.f32 %v702_v25, %v2414_v55 }
 0x329   :  { %v730_v57 = vpack.c.bf16 %v715_v23, %v714_v24  ;;  %v1364_v33 = vsel %vm529_vm7, %v715_v23, 0.0 }
 0x32a   :  { %v687_v63 = vpop.permute.xlu1 %686 }
 0x32b   :  { %1792 = vmatprep.mubr.msk.bf16.mxu0 %vm529_vm7, %v730_v57  ;;  %v720_v52 = vmul.f32 %v687_v63, %v2375_v44  ;;  %v712_v35 = vpop.permute.xlu0 %711  ;;  %v2561_v57 = vld [vmem:[%s2862_s1 + $0x58] sm:$0xff]  ;;  %v1674_v63 = vld [vmem:[%s2863_s3 + $0x20] ss:$0 sm:$0xff] }
 0x32c   :  { %1793 = vmatmul.mubr.msk.bf16.vlgmr.msra.gmra.mxu0 %vm529_vm7, %v731_v26  ;;  %v1991_v44 = vpop.eup %1990  ;;  %v725_v60 = vmul.f32 %v712_v35, %v2411_v54  ;;  %v1024_v61 = vmul.f32 %v2561_v57, %v2561_v57 }
 0x32d   :  { %v1358_v5 = vsel %vm529_vm7, %v720_v52, 0.0  ;;  %v1993_v13 = vpop.eup %1992  ;;  %v1401_v14 = vmul.f32 %v1991_v44, %v2453_v19  ;;  %v1483_v19 = vsel %vm64_vm0, %v1416_v21, 0 }
 0x32e   :  { %v677_v2 = vpop.permute.xlu1 %676  ;;  %v1373_v17 = vsel %vm529_vm7, %v725_v60, 0.0  ;;  %v1400_v28 = vmul.f32 %v1993_v13, %v2447_v43  ;;  %v1709_v43 = vld [vmem:[%s2863_s3 + $0x38] ss:$0 sm:$0xff]  ;;  %1059 = vrot.lane.b32.xlu0 %v1024_v61, %s2116_s15 }
 0x32f   :  { %v718_v59 = vmul.f32 %v677_v2, %v2381_v37  ;;  %v1366_v37 = vadd.f32 %v1365_v49, %v1364_v33 }
 0x331   :  { %v1356_v15 = vsel %vm529_vm7, %v718_v59, 0.0 }
 0x332   :  { %v692_v6 = vpop.permute.xlu1 %691  ;;  %v1357_v36 = vadd.f32 %v1356_v15, %v1355_v7 }
 0x333   :  { %v721_v11 = vmul.f32 %v692_v6, %v2387_v58 }
 0x334   :  { %v1359_v12 = vadd.f32 %v1358_v5, %v1357_v36 }
 0x335   :  { %v733_v8 = vpack.c.bf16 %v721_v11, %v720_v52  ;;  %v1369_v41 = vsel %vm529_vm7, %v721_v11, 0.0 }
 0x336   :  { %v682_v18 = vpop.permute.xlu1 %681 }
 0x337   :  { %v719_v27 = vmul.f32 %v682_v18, %v2390_v32  ;;  %v1371_v32 = vsel %vm529_vm7, %v723_v51, 0.0 }
 0x339   :  { %v732_v39 = vpack.c.bf16 %v719_v27, %v718_v59  ;;  %v1367_v31 = vsel %vm529_vm7, %v719_v27, 0.0 }
 0x33a   :  { %v1368_v58 = vadd.f32 %v1367_v31, %v1366_v37  ;;  %v697_v38 = vpop.permute.xlu1 %696 }
 0x33b   :  { %v722_v45 = vmul.f32 %v697_v38, %v2405_v40  ;;  %1796 = vmatprep.mubr.msk.bf16.mxu0 %vm529_vm7, %v732_v39 }
 0x33c   :  { %v1370_v55 = vadd.f32 %v1369_v41, %v1368_v58  ;;  %1797 = vmatmul.mubr.msk.bf16.gmra.mxu0 %vm529_vm7, %v733_v8 }
 0x33d   :  { %v734_v3 = vpack.c.bf16 %v723_v51, %v722_v45  ;;  %v1360_v62 = vsel %vm529_vm7, %v722_v45, 0.0 }
 0x33e   :  { %v1372_v9 = vadd.f32 %v1371_v32, %v1370_v55  ;;  %v707_v10 = vpop.permute.xlu1 %706  ;;  %v1361_v16 = vadd.f32 %v1360_v62, %v1359_v12 }
 0x33f   :  { %v724_v40 = vmul.f32 %v707_v10, %v2402_v56  ;;  %1800 = vmatprep.mubr.msk.bf16.mxu0 %vm529_vm7, %v734_v3  ;;  %v1708_v56 = vld [vmem:[%s2863_s3 + $0x30] ss:$0 sm:$0xff] }
 0x340   :  { %v1374_v47 = vadd.f32 %v1373_v17, %v1372_v9  ;;  %v1408_v22 = vmul.f32 %v1708_v56, %v1401_v14  ;;  %v1407_v24 = vmul.f32 %v1708_v56, %v1400_v28 }
 0x341   :  { %v735_v20 = vpack.c.bf16 %v725_v60, %v724_v40  ;;  %v1362_v54 = vsel %vm529_vm7, %v724_v40, 0.0 }
 0x342   :  { %v1363_v42 = vadd.f32 %v1362_v54, %v1361_v16  ;;  %v1415_v23 = vadd.f32 %v1709_v43, %v1408_v22  ;;  %v1414_v1 = vadd.f32 %v1709_v43, %v1407_v24  ;;  %v2614_v22 = vld [vmem:[%s2863_s3 + $0x28] ss:$0 sm:$0xff] }
 0x344   :  { %v1422_v50 = vpack.c.bf16 %v1374_v47, %v1363_v42  ;;  %1801 = vmatmul.mubr.msk.bf16.gmra.mxu0 %vm529_vm7, %v735_v20  ;;  %v1417_v30 = vpack.c.bf16 %v1415_v23, %v1414_v1 }
 0x345   :  { %1820 = vmatprep.mubr.msk.bf16.mxu0 %vm2114_vm2, %v2112_v0 }
 0x346   :  { %1809 = vmatmul.mubr.msk.bf16.vlgmr.msra.gmra.mxu1 %vm529_vm7, %v1422_v50 }
 0x347   :  { %1813 = vmatpush3.bf16.msra.mxu1 %v1483_v19  ;;  %1814 = vmatprep.mubr.msk.bf16.mxu1 %vm2114_vm2, %v2112_v0  ;;  %v1845_v0 = vld [vmem:[%s2860_s2 + $0x48] sm:$0x3f]   ;;  %v1714_v19 = vld [vmem:[%s2863_s3 + $0x40] ss:$0 sm:$0xff] }
 0x348   :  { %v1566_v26 = vsel %vm1564_vm8, %v1845_v0, 0 }
 0x349   :  { %1819 = vmatpush3.bf16.msra.mxu0 %v1566_v26 }
 0x34e   :  { %1815 = vmatmul.mubr.msk.bf16.vlgmr.msra.gmra.mxu1 %vm154_vm3, %v1417_v30 }
 0x3ec   :  { %v1794_v46 = vpop.f32.mrf.mxu0 }
 0x3ed   :  { %v2572_v34 = vadd.f32 %v1794_v46, %v1674_v63 }
 0x3ee   :  { %v805_v2 = vpop.f32.mrf.mxu0 }
 0x3ef   :  { %v1685_v6 = vmul.f32 -1.442695, %v2572_v34  ;;  %v2575_v59 = vadd.f32 %v1674_v63, %v805_v2 }
 0x3f0   :  { %v1795_v25 = vpop.f32.mrf.mxu0 }
 0x3f1   :  { %1994 = vpow2.f32 %v1685_v6  ;;  %v1683_v4 = vmul.f32 -1.442695, %v2575_v59  ;;  %v2578_v53 = vadd.f32 %v1795_v25, %v1674_v63 }
 0x3f2   :  { %v808_v33 = vpop.f32.mrf.mxu0 }
 0x3f3   :  { %1996 = vpow2.f32 %v1683_v4  ;;  %v1686_v11 = vmul.f32 -1.442695, %v2578_v53  ;;  %v2581_v18 = vadd.f32 %v1674_v63, %v808_v33 }
 0x3f5   :  { %1998 = vpow2.f32 %v1686_v11  ;;  %v1684_v49 = vmul.f32 -1.442695, %v2581_v18 }
 0x3f7   :  { %2000 = vpow2.f32 %v1684_v49 }
 0x3fc   :  { %v1798_v15 = vpop.f32.mrf.mxu0 }
 0x3fd   :  { %v2584_v27 = vadd.f32 %v1798_v15, %v1674_v63 }
 0x3fe   :  { %v1995_v7 = vpop.eup %1994  ;;  %v821_v51 = vpop.f32.mrf.mxu0 }
 0x3ff   :  { %v890_v37 = vadd.f32 1.0, %v1995_v7  ;;  %v1689_v52 = vmul.f32 -1.442695, %v2584_v27  ;;  %v2587_v39 = vadd.f32 %v1674_v63, %v821_v51 }
 0x400   :  { %v1997_v31 = vpop.eup %1996  ;;  %v1799_v35 = vpop.f32.mrf.mxu0 }
 0x401   :  { %2002 = vrcp.f32 %v890_v37  ;;  %v888_v36 = vadd.f32 1.0, %v1997_v31  ;;  %v1687_v8 = vmul.f32 -1.442695, %v2587_v39  ;;  %v2590_v58 = vadd.f32 %v1799_v35, %v1674_v63 }
 0x402   :  { %v1999_v38 = vpop.eup %1998  ;;  %2004 = vpow2.f32 %v1689_v52  ;;  %v824_v41 = vpop.f32.mrf.mxu0 }
 0x403   :  { %2006 = vrcp.f32 %v888_v36  ;;  %v891_v45 = vadd.f32 1.0, %v1999_v38  ;;  %v1690_v32 = vmul.f32 -1.442695, %v2590_v58  ;;  %v2593_v55 = vadd.f32 %v1674_v63, %v824_v41 }
 0x404   :  { %v2001_v44 = vpop.eup %2000  ;;  %2008 = vpow2.f32 %v1687_v8  ;;  %v1802_v60 = vpop.f32.mrf.mxu0 }
 0x405   :  { %2010 = vrcp.f32 %v891_v45  ;;  %v889_v5 = vadd.f32 1.0, %v2001_v44  ;;  %v1688_v3 = vmul.f32 -1.442695, %v2593_v55  ;;  %v2596_v62 = vadd.f32 %v1802_v60, %v1674_v63 }
 0x406   :  { %2012 = vpow2.f32 %v1690_v32  ;;  %v837_v9 = vpop.f32.mrf.mxu0  ;;  %v1472_v12 = vpop.f32.mrf.mxu1 }
 0x407   :  { %2014 = vrcp.f32 %v889_v5  ;;  %v1693_v10 = vmul.f32 -1.442695, %v2596_v62  ;;  %v2599_v13 = vadd.f32 %v1674_v63, %v837_v9 }
 0x408   :  { %2016 = vpow2.f32 %v1688_v3  ;;  %v1803_v40 = vpop.f32.mrf.mxu0  ;;  %v1810_v14 = vpop.f32.mrf.mxu1 }
 0x409   :  { %2018 = vpow2.f32 %v1693_v10  ;;  %v1691_v16 = vmul.f32 -1.442695, %v2599_v13  ;;  %v2602_v17 = vadd.f32 %v1803_v40, %v1674_v63  ;;  %v2117_v14 = vmov 1  }
 0x40a   :  { %v840_v20 = vpop.f32.mrf.mxu0  ;;  %v1475_v54 = vpop.f32.mrf.mxu1  ;;  %1837 = vset.pattern.permute.xlu1 %v2117_v14  ;;  %1838 = vset.pattern.permute.xlu0 %v2117_v14 }
 0x40b   :  { %2020 = vpow2.f32 %v1691_v16  ;;  %v1694_v21 = vmul.f32 -1.442695, %v2602_v17  ;;  %v2605_v28 = vadd.f32 %v1674_v63, %v840_v20 }
 0x40c   :  { %v1811_v42 = vpop.f32.mrf.mxu1 }
 0x40d   :  { %2022 = vpow2.f32 %v1694_v21  ;;  %v1692_v47 = vmul.f32 -1.442695, %v2605_v28 }
 0x40e   :  { %v2003_v56 = vpop.eup %2002  ;;  %v1519_v50 = vpop.f32.mrf.mxu1 }
 0x40f   :  { %v2005_v24 = vpop.eup %2004  ;;  %v926_v43 = vmul.f32 %v2003_v56, %v2572_v34  ;;  %2024 = vpow2.f32 %v1692_v47  ;;  %v1520_v23 = vadd.f32 %v1519_v50, %v1472_v12 }
 0x410   :  { %v2007_v1 = vpop.eup %2006  ;;  %v894_v30 = vadd.f32 1.0, %v2005_v24  ;;  %v1816_v61 = vpop.f32.mrf.mxu1 }
 0x411   :  { %v2009_v0 = vpop.eup %2008  ;;  %v924_v26 = vmul.f32 %v2007_v1, %v2575_v59  ;;  %v2618_v63 = vadd.f32 %v1714_v19, %v1520_v23  ;;  %v943_v46 = vmul.f32 %v2614_v22, %v926_v43  ;;  %v1038_v1 = vpop.permute.xlu1 %1037 }
 0x412   :  { %v2011_v2 = vpop.eup %2010  ;;  %2026 = vrcp.f32 %v894_v30  ;;  %v892_v6 = vadd.f32 1.0, %v2009_v0  ;;  %v1522_v25 = vpop.f32.mrf.mxu1  ;;  %v1074_v0 = vsel %vm1073_vm9, %v1038_v1, 0.0 }
 0x413   :  { %v2013_v4 = vpop.eup %2012  ;;  %v927_v33 = vmul.f32 %v2011_v2, %v2578_v53  ;;  %v1715_v34 = vmul.f32 -1.442695, %v2618_v63  ;;  %v1523_v11 = vadd.f32 %v1522_v25, %v1475_v54  ;;  %957 = vadd.xlane.f32.xlu0 %v943_v46  ;;  %v941_v49 = vmul.f32 %v2614_v22, %v924_v26  ;;  %v1040_v2 = vpop.permute.xlu0 %1039 }
 0x414   :  { %v2015_v15 = vpop.eup %2014  ;;  %2028 = vrcp.f32 %v892_v6  ;;  %v895_v59 = vadd.f32 1.0, %v2013_v4  ;;  %v1817_v7 = vpop.f32.mrf.mxu1  ;;  %v1077_v6 = vsel %vm1073_vm9, %v1040_v2, 0.0 }
 0x415   :  { %v2017_v51 = vpop.eup %2016  ;;  %v925_v37 = vmul.f32 %v2015_v15, %v2581_v18  ;;  %2030 = vpow2.f32 %v1715_v34  ;;  %v2625_v52 = vadd.f32 %v1714_v19, %v1523_v11  ;;  %953 = vadd.xlane.f32.xlu1 %v941_v49  ;;  %v944_v38 = vmul.f32 %v2614_v22, %v927_v33  ;;  %v1042_v25 = vpop.permute.xlu1 %1041 }
 0x416   :  { %v2019_v31 = vpop.eup %2018  ;;  %2032 = vrcp.f32 %v895_v59  ;;  %v893_v53 = vadd.f32 1.0, %v2017_v51  ;;  %v1080_v4 = vsel %vm1073_vm9, %v1042_v25, 0.0 }
 0x417   :  { %v898_v35 = vadd.f32 1.0, %v2019_v31  ;;  %v1716_v36 = vmul.f32 -1.442695, %v2625_v52  ;;  %v942_v8 = vmul.f32 %v2614_v22, %v925_v37  ;;  %v1044_v33 = vpop.permute.xlu0 %1043 }
 0x418   :  { %v2021_v41 = vpop.eup %2020  ;;  %2034 = vrcp.f32 %v893_v53 }
 0x419   :  { %2036 = vrcp.f32 %v898_v35  ;;  %v896_v45 = vadd.f32 1.0, %v2021_v41  ;;  %955 = vadd.xlane.f32.xlu0 %v942_v8  ;;  %959 = vadd.xlane.f32.xlu1 %v944_v38  ;;  %v1046_v49 = vpop.permute.xlu1 %1045 }
 0x41a   :  { %v2023_v18 = vpop.eup %2022  ;;  %2038 = vpow2.f32 %v1716_v36  ;;  %v1086_v7 = vsel %vm1073_vm9, %v1046_v49, 0.0 }
 0x41b   :  { %2040 = vrcp.f32 %v896_v45  ;;  %v899_v32 = vadd.f32 1.0, %v2023_v18  ;;  %v1048_v59 = vpop.permute.xlu0 %1047 }
 0x41c   :  { %v2025_v44 = vpop.eup %2024 }
 0x41d   :  { %2042 = vrcp.f32 %v899_v32  ;;  %v897_v60 = vadd.f32 1.0, %v2025_v44  ;;  %v1050_v51 = vpop.permute.xlu1 %1049 }
 0x41e   :  { %v1092_v37 = vsel %vm1073_vm9, %v1050_v51, 0.0 }
 0x41f   :  { %v2027_v5 = vpop.eup %2026  ;;  %2044 = vrcp.f32 %v897_v60  ;;  %v1052_v31 = vpop.permute.xlu0 %1051 }
 0x420   :  { %v930_v3 = vmul.f32 %v2027_v5, %v2584_v27 }
 0x421   :  { %v2029_v9 = vpop.eup %2028 }
 0x422   :  { %v2031_v12 = vpop.eup %2030  ;;  %v928_v10 = vmul.f32 %v2029_v9, %v2587_v39  ;;  %v947_v40 = vmul.f32 %v2614_v22, %v930_v3 }
 0x423   :  { %v2033_v16 = vpop.eup %2032  ;;  %v1539_v54 = vadd.f32 1.0, %v2031_v12  ;;  %v1056_v35 = vpop.permute.xlu0 %1055 }
 0x424   :  { %v931_v20 = vmul.f32 %v2033_v16, %v2590_v58  ;;  %965 = vadd.xlane.f32.xlu0 %v947_v40  ;;  %v945_v27 = vmul.f32 %v2614_v22, %v928_v10  ;;  %v1101_v36 = vsel %vm1073_vm9, %v1056_v35, 0.0 }
 0x425   :  { %v2035_v21 = vpop.eup %2034  ;;  %2046 = vrcp.f32 %v1539_v54 }
 0x426   :  { %v2037_v42 = vpop.eup %2036  ;;  %v929_v47 = vmul.f32 %v2035_v21, %v2593_v55  ;;  %v948_v56 = vmul.f32 %v2614_v22, %v931_v20 }
 0x427   :  { %v2039_v50 = vpop.eup %2038  ;;  %v934_v39 = vmul.f32 %v2037_v42, %v2596_v62  ;;  %v1060_v41 = vpop.permute.xlu0 %1059 }
 0x428   :  { %v2041_v19 = vpop.eup %2040  ;;  %v1540_v24 = vadd.f32 1.0, %v2039_v50  ;;  %961 = vadd.xlane.f32.xlu0 %v945_v27  ;;  %967 = vadd.xlane.f32.xlu1 %v948_v56  ;;  %v946_v55 = vmul.f32 %v2614_v22, %v929_v47  ;;  %v1107_v45 = vsel %vm1073_vm9, %v1060_v41, 0.0 }
 0x429   :  { %v951_v58 = vmul.f32 %v2614_v22, %v934_v39  ;;  %v932_v23 = vmul.f32 %v2041_v19, %v2599_v13 }
 0x42a   :  { %v2043_v43 = vpop.eup %2042  ;;  %2048 = vrcp.f32 %v1540_v24 }
 0x42b   :  { %v935_v30 = vmul.f32 %v2043_v43, %v2602_v17  ;;  %v949_v46 = vmul.f32 %v2614_v22, %v932_v23 }
 0x42c   :  { %v2045_v61 = vpop.eup %2044  ;;  %963 = vadd.xlane.f32.xlu1 %v946_v55  ;;  %973 = vadd.xlane.f32.xlu0 %v951_v58 }
 0x42d   :  { %v933_v62 = vmul.f32 %v2045_v61, %v2605_v28  ;;  %v952_v26 = vmul.f32 %v2614_v22, %v935_v30 }
 0x42f   :  { %v950_v13 = vmul.f32 %v2614_v22, %v933_v62  ;;  %v1083_v22 = vsel %vm1073_vm9, %v1044_v33, 0.0 }
 0x430   :  { %1075 = vadd.xlane.f32.xlu1 %v1074_v0  ;;  %969 = vadd.xlane.f32.xlu0 %v949_v46 }
 0x432   :  { %v2047_v17 = vpop.eup %2046 }
 0x433   :  { %v1545_v34 = vmul.f32 %v2047_v17, %v2618_v63  ;;  %v1095_v63 = vsel %vm1073_vm9, %v1052_v31, 0.0 }
 0x434   :  { %1078 = vadd.xlane.f32.xlu1 %v1077_v6 }
 0x437   :  { %v2049_v28 = vpop.eup %2048 }
 0x438   :  { %v1546_v11 = vmul.f32 %v2049_v28, %v2625_v52  ;;  %1081 = vadd.xlane.f32.xlu1 %v1080_v4  ;;  %v1054_v52 = vpop.permute.xlu1 %1053 }
 0x439   :  { %v1098_v53 = vsel %vm1073_vm9, %v1054_v52, 0.0  ;;  %v2705_v52 = vld [vmem:[%s2861_s0] sm:$0xff] }
 0x43a   :  { %v1549_v15 = vpack.c.bf16 %v1546_v11, %v1545_v34 }
 0x43c   :  { %1821 = vmatmul.mubr.msk.bf16.vlgmr.msra.gmra.mxu0 %vm1560_vm10, %v1549_v15  ;;  %1084 = vadd.xlane.f32.xlu1 %v1083_v22  ;;  %v1058_v8 = vpop.permute.xlu1 %1057 }
 0x43d   :  { %v1104_v38 = vsel %vm1073_vm9, %v1058_v8, 0.0 }
 0x440   :  { %1087 = vadd.xlane.f32.xlu1 %v1086_v7 }
 0x444   :  { %1093 = vadd.xlane.f32.xlu1 %v1092_v37 }
 0x446   :  { %1231 = vrot.lane.b32.xlu0 %v2433_v29, %s2118_s5  ;;  %v1089_v29 = vsel %vm1073_vm9, %v1048_v59, 0.0  ;;  %v1717_v59 = vld [vmem:[%s2863_s3 + $0x48] ss:$0 sm:$0xff]  ;;  %s2119_s3 = smov 127  }
 0x448   :  { %1096 = vadd.xlane.f32.xlu1 %v1095_v63 }
 0x44c   :  { %1099 = vadd.xlane.f32.xlu1 %v1098_v53 }
 0x450   :  { %1102 = vadd.xlane.f32.xlu1 %v1101_v36 }
 0x454   :  { %1105 = vadd.xlane.f32.xlu1 %v1104_v38 }
 0x458   :  { %975 = vadd.xlane.f32.xlu1 %v952_v26 }
 0x45c   :  { %971 = vadd.xlane.f32.xlu1 %v950_v13 }
 0x460   :  { %1108 = vadd.xlane.f32.xlu1 %v1107_v45 }
 0x465   :  { %1090 = vadd.xlane.f32.xlu0 %v1089_v29 }
 0x49c   :  { %v958_v18 = vpop.xlane.xlu0 %957 }
 0x49d   :  { %v979_v60 = vadd.f32 %v958_v18, %v2436_v48 }
 0x49e   :  { %v954_v32 = vpop.xlane.xlu1 %953 }
 0x49f   :  { %v977_v44 = vadd.f32 %v954_v32, %v2436_v48  ;;  %v1698_v10 = vclamps-f32 %v979_v60, 1.0 }
 0x4a1   :  { %v1696_v5 = vclamps-f32 %v977_v44, 1.0  ;;  %v2722_v44 = vld [vmem:[%s2861_s0 + $0x8] sm:$0xff] }
 0x4a2   :  { %v960_v3 = vpop.xlane.xlu1 %959  ;;  %v956_v9 = vpop.xlane.xlu0 %955 }
 0x4a3   :  { %v978_v12 = vadd.f32 %v956_v9, %v2436_v48  ;;  %1250 = vperm.xlu1 %1837, %v1696_v5   ;;  %v980_v40 = vadd.f32 %v960_v3, %v2436_v48 }
 0x4a5   :  { %v1697_v14 = vclamps-f32 %v978_v12, 1.0  ;;  %v1699_v16 = vclamps-f32 %v980_v40, 1.0 }
 0x4a7   :  { %1260 = vperm.xlu1 %1837, %v1698_v10   ;;  %1255 = vperm.xlu0 %1838, %v1697_v14  }
 0x4ab   :  { %1265 = vperm.xlu1 %1837, %v1699_v16  }
 0x4ad   :  { %v966_v20 = vpop.xlane.xlu0 %965 }
 0x4ae   :  { %v983_v54 = vadd.f32 %v966_v20, %v2436_v48 }
 0x4b0   :  { %v1702_v21 = vclamps-f32 %v983_v54, 1.0 }
 0x4b1   :  { %v968_v42 = vpop.xlane.xlu1 %967  ;;  %v962_v47 = vpop.xlane.xlu0 %961 }
 0x4b2   :  { %v981_v27 = vadd.f32 %v962_v47, %v2436_v48  ;;  %1280 = vperm.xlu1 %1837, %v1702_v21   ;;  %v984_v56 = vadd.f32 %v968_v42, %v2436_v48 }
 0x4b4   :  { %v1700_v50 = vclamps-f32 %v981_v27, 1.0  ;;  %v1703_v24 = vclamps-f32 %v984_v56, 1.0 }
 0x4b5   :  { %v964_v39 = vpop.xlane.xlu1 %963  ;;  %v974_v19 = vpop.xlane.xlu0 %973 }
 0x4b6   :  { %1270 = vperm.xlu1 %1837, %v1700_v50   ;;  %v982_v58 = vadd.f32 %v964_v39, %v2436_v48  ;;  %v987_v49 = vadd.f32 %v974_v19, %v2436_v48 }
 0x4b8   :  { %v1701_v55 = vclamps-f32 %v982_v58, 1.0  ;;  %v1706_v15 = vclamps-f32 %v987_v49, 1.0 }
 0x4b9   :  { %v2669_v43 = vpop.xlane.xlu1 %1075  ;;  %v970_v23 = vpop.xlane.xlu0 %969 }
 0x4ba   :  { %1285 = vperm.xlu1 %1837, %v1703_v24   ;;  %v985_v1 = vadd.f32 %v970_v23, %v2436_v48  ;;  %2050 = vrsqrt.f32 %v2669_v43  ;;  %vm1112_vm11 = vcmp.eq.f32.partialorder %v2669_v43, inf  ;;  %v1115_v5 = vand.u32 2147483648, %v2669_v43 }
 0x4bb   :  { %vm1114_vm13 = vcmp.eq.f32.partialorder %v2669_v43, 0.0 }
 0x4bc   :  { %v1704_v62 = vclamps-f32 %v985_v1, 1.0 }
 0x4bd   :  { %v2672_v30 = vpop.xlane.xlu1 %1078  ;;  %v1232_v61 = vpop.permute.xlu0 %1231 }
 0x4be   :  { %1275 = vperm.xlu1 %1837, %v1701_v55   ;;  %1825 = vpush %v1232_v61  ;;  %vm1119_vm14 = vcmp.eq.f32.partialorder %v2672_v30, inf  ;;  %v1122_v14 = vand.u32 2147483648, %v2672_v30  ;;  %vm1121_vm1 = vcmp.eq.f32.partialorder %v2672_v30, 0.0 }
 0x4c1   :  { %v2674_v0 = vpop.xlane.xlu1 %1081 }
 0x4c2   :  { %1290 = vperm.xlu1 %1837, %v1704_v62   ;;  %2052 = vrsqrt.f32 %v2674_v0  ;;  %vm1126_vm12 = vcmp.eq.f32.partialorder %v2674_v0, inf  ;;  %v1129_v10 = vand.u32 2147483648, %v2674_v0  ;;  %vm1128_vm15 = vcmp.eq.f32.partialorder %v2674_v0, 0.0 }
 0x4c3   :  { %2054 = vrsqrt.f32 %v2672_v30 }
 0x4c5   :  { %v2676_v26 = vpop.xlane.xlu1 %1084 }
 0x4c6   :  { %2056 = vrsqrt.f32 %v2676_v26  ;;  %vm1133_vm0 = vcmp.eq.f32.partialorder %v2676_v26, inf  ;;  %v1136_v42 = vand.u32 2147483648, %v2676_v26  ;;  %vm1135_vm2 = vcmp.eq.f32.partialorder %v2676_v26, 0.0 }
 0x4c7   :  { %v2051_v7 = vpop.eup %2050 }
 0x4c8   :  { %v1111_v63 = vmul.f32 %v2051_v7, %v2669_v43 }
 0x4c9   :  { %v2678_v46 = vpop.xlane.xlu1 %1087 }
 0x4ca   :  { %v1113_v29 = vsel %vm1112_vm11, %v2669_v43, %v1111_v63  ;;  %vm1140_vm4 = vcmp.eq.f32.partialorder %v2678_v46, inf  ;;  %v1143_v61 = vand.u32 2147483648, %v2678_v46  ;;  %vm1142_vm6 = vcmp.eq.f32.partialorder %v2678_v46, 0.0 }
 0x4cb   :  { %v1116_v12 = vsel %vm1114_vm13, %v1115_v5, %v1113_v29  ;;  %vm1320_vm13 = vcmask 80952  }
 0x4cc   :  { %v1194_v20 = vadd.f32 1.0, %v1116_v12 }
 0x4cd   :  { %v2680_v2 = vpop.xlane.xlu1 %1093 }
 0x4ce   :  { %2058 = vrsqrt.f32 %v2680_v2  ;;  %v1157_v1 = vand.u32 2147483648, %v2680_v2  ;;  %vm1156_vm5 = vcmp.eq.f32.partialorder %v2680_v2, 0.0 }
 0x4cf   :  { %2060 = vrsqrt.f32 %v2678_v46 }
 0x4d1   :  { %v2682_v13 = vpop.xlane.xlu1 %1096 }
 0x4d2   :  { %2062 = vrsqrt.f32 %v2682_v13  ;;  %vm1161_vm7 = vcmp.eq.f32.partialorder %v2682_v13, inf  ;;  %v1164_v49 = vand.u32 2147483648, %v2682_v13  ;;  %vm1163_vm9 = vcmp.eq.f32.partialorder %v2682_v13, 0.0 }
 0x4d5   :  { %v2684_v6 = vpop.xlane.xlu1 %1099 }
 0x4d6   :  { %vm1168_vm11 = vcmp.eq.f32.partialorder %v2684_v6, inf }
 0x4d9   :  { %v2686_v25 = vpop.xlane.xlu1 %1102 }
 0x4dd   :  { %v2688_v17 = vpop.xlane.xlu1 %1105 }
 0x4e1   :  { %v976_v4 = vpop.xlane.xlu1 %975 }
 0x4e2   :  { %v988_v33 = vadd.f32 %v976_v4, %v2436_v48 }
 0x4e4   :  { %v1707_v28 = vclamps-f32 %v988_v33, 1.0 }
 0x4e5   :  { %v972_v34 = vpop.xlane.xlu1 %971 }
 0x4e6   :  { %v986_v11 = vadd.f32 %v972_v34, %v2436_v48  ;;  %1305 = vperm.xlu0 %1838, %v1707_v28   ;;  %v2053_v48 = vpop.eup %2052 }
 0x4e7   :  { %v2055_v35 = vpop.eup %2054  ;;  %v1125_v8 = vmul.f32 %v2053_v48, %v2674_v0 }
 0x4e8   :  { %v1705_v22 = vclamps-f32 %v986_v11, 1.0  ;;  %v2057_v41 = vpop.eup %2056  ;;  %v1118_v18 = vmul.f32 %v2055_v35, %v2672_v30 }
 0x4e9   :  { %v1127_v3 = vsel %vm1126_vm12, %v2674_v0, %v1125_v8  ;;  %v1132_v9 = vmul.f32 %v2057_v41, %v2676_v26  ;;  %v2059_v47 = vpop.eup %2058  ;;  %v1171_v8 = vand.u32 2147483648, %v2684_v6  ;;  %v2102_v41 = vld [vmem:[%s2862_s1 + $0x10] sm:$0xff]  ;;  %vm1170_vm12 = vcmp.eq.f32.partialorder %v2684_v6, 0.0 }
 0x4ea   :  { %1295 = vperm.xlu1 %1837, %v1705_v22   ;;  %v1120_v40 = vsel %vm1119_vm14, %v2672_v30, %v1118_v18  ;;  %v1130_v16 = vsel %vm1128_vm15, %v1129_v10, %v1127_v3  ;;  %v2061_v50 = vpop.eup %2060  ;;  %v1153_v19 = vmul.f32 %v2059_v47, %v2680_v2  ;;  %v2103_v3 = vld [vmem:[%s2862_s1 + $0x8] sm:$0xff]  ;;  %vm1175_vm15 = vcmp.eq.f32.partialorder %v2686_v25, inf }
 0x4eb   :  { %v1134_v54 = vsel %vm1133_vm0, %v2676_v26, %v1132_v9  ;;  %v1123_v21 = vsel %vm1121_vm1, %v1122_v14, %v1120_v40  ;;  %v1196_v27 = vadd.f32 1.0, %v1130_v16  ;;  %v1139_v58 = vmul.f32 %v2061_v50, %v2678_v46  ;;  %v2063_v43 = vpop.eup %2062 }
 0x4ec   :  { %v1137_v56 = vsel %vm1135_vm2, %v1136_v42, %v1134_v54  ;;  %v1195_v39 = vadd.f32 1.0, %v1123_v21  ;;  %v1160_v0 = vmul.f32 %v2063_v43, %v2682_v13  ;;  %vm1177_vm1 = vcmp.eq.f32.partialorder %v2686_v25, 0.0 }
 0x4ed   :  { %v1197_v24 = vadd.f32 1.0, %v1137_v56  ;;  %v1141_v30 = vsel %vm1140_vm4, %v2678_v46, %v1139_v58  ;;  %vm1182_vm2 = vcmp.eq.f32.partialorder %v2688_v17, inf  ;;  %vm1613_vm4 = vcmask 72752  }
 0x4ee   :  { %1300 = vperm.xlu1 %1837, %v1706_v15   ;;  %v2717_v32 = vpop.xlane.xlu0 %1090  ;;  %v1144_v33 = vsel %vm1142_vm6, %v1143_v61, %v1141_v30  ;;  %v1162_v34 = vsel %vm1161_vm7, %v2682_v13, %v1160_v0  ;;  %v2765_v15 = vpop.xlane.xlu1 %1108  ;;  %v2106_v30 = vld [vmem:[%s2862_s1 + $0x20] sm:$0xff] }
 0x4ef   :  { %2064 = vrsqrt.f32 %v2717_v32  ;;  %vm1147_vm8 = vcmp.eq.f32.partialorder %v2717_v32, inf  ;;  %s1826_s0 = spop %1825  ;;  %v1198_v11 = vadd.f32 1.0, %v1144_v33  ;;  %vm1149_vm10 = vcmp.eq.f32.partialorder %v2717_v32, 0.0 }
 0x4f0   :  { %2066 = vrsqrt.f32 %v2684_v6  ;;  %vm1189_vm14 = vcmp.eq.f32.partialorder %v2765_v15, inf  ;;  %vm1191_vm0 = vcmp.eq.f32.partialorder %v2765_v15, 0.0 }
 0x4f1   :  { %2068 = vrcp.f32 %v1194_v20 }
 0x4f2   :  { %2070 = vrcp.f32 %v1196_v27 }
 0x4f3   :  { %2072 = vrcp.f32 %v1195_v39 }
 0x4f4   :  { %2074 = vrcp.f32 %v1197_v24 }
 0x4fc   :  { %v1602_v51 = vpop.f32.mrf.mxu0  ;;  %v2065_v55 = vpop.eup %2064 }
 0x4fd   :  { %v1603_v37 = vadd.f32 %v1717_v59, %v1602_v51  ;;  %v1146_v26 = vmul.f32 %v2065_v55, %v2717_v32  ;;  %v2067_v4 = vpop.eup %2066  ;;  %v1165_v51 = vsel %vm1163_vm9, %v1164_v49, %v1162_v34 }
 0x4fe   :  { %v1822_v31 = vpop.f32.mrf.mxu0  ;;  %v1167_v22 = vmul.f32 %v2067_v4, %v2684_v6 }
 0x4ff   :  { %v1609_v53 = vadd.f32 %v2705_v52, %v1603_v37  ;;  %v1148_v46 = vsel %vm1147_vm8, %v2717_v32, %v1146_v26  ;;  %v2770_v37 = vstv %s1826_s0  ;;  %v2101_v31 = vld [vmem:[%s2862_s1] sm:$0xff] }
 0x500   :  { %v1605_v36 = vpop.f32.mrf.mxu0  ;;  %v1169_v13 = vsel %vm1168_vm11, %v2684_v6, %v1167_v22  ;;  %v2104_v6 = vld [vmem:[%s2862_s1 + $0x18] sm:$0xff]  ;;  %v2108_v22 = vld [vmem:[%s2862_s1 + $0x28] sm:$0xff] }
 0x501   :  { %1611 = vst.msk [vmem:[%s2864_s4] sm:$0xff] %vm154_vm3, %v1609_v53  ;;  %v1606_v38 = vadd.f32 %v1717_v59, %v1605_v36  ;;  %v1150_v59 = vand.u32 2147483648, %v2717_v32  ;;  %v1201_v36 = vadd.f32 1.0, %v1165_v51  ;;  %v1172_v32 = vsel %vm1170_vm12, %v1171_v8, %v1169_v13  ;;  %v2109_v13 = vld [vmem:[%s2862_s1 + $0x40] sm:$0xff] }
 0x502   :  { %v1823_v45 = vpop.f32.mrf.mxu0  ;;  %v1202_v20 = vadd.f32 1.0, %v1172_v32 }
 0x503   :  { %v1610_v60 = vadd.f32 %v2722_v44, %v1606_v38  ;;  %v1151_v48 = vsel %vm1149_vm10, %v1150_v59, %v1148_v46 }
 0x504   :  { %v1199_v18 = vadd.f32 1.0, %v1151_v48 }
 0x505   :  { %1612 = vst.msk [vmem:[%s2864_s4 + $0x8] sm:$0xff] %vm154_vm3, %v1610_v60  ;;  %vm1154_vm3 = vcmp.eq.f32.partialorder %v2680_v2, inf }
 0x506   :  { %v1155_v23 = vsel %vm1154_vm3, %v2680_v2, %v1153_v19  ;;  %v2069_v2 = vpop.eup %2068  ;;  %vm1184_vm3 = vcmp.eq.f32.partialorder %v2688_v17, 0.0 }
 0x507   :  { %v1158_v62 = vsel %vm1156_vm5, %v1157_v1, %v1155_v23  ;;  %v2071_v7 = vpop.eup %2070  ;;  %v1218_v63 = vmul.f32 %v2101_v31, %v2069_v2  ;;  %v2105_v23 = vld [vmem:[%s2862_s1 + $0x30] sm:$0xff] }
 0x508   :  { %v1200_v28 = vadd.f32 1.0, %v1158_v62  ;;  %v2073_v53 = vpop.eup %2072  ;;  %v1220_v45 = vmul.f32 %v2102_v41, %v2071_v7 }
 0x509   :  { %v1236_v38 = vmul.f32 %v2770_v37, %v1218_v63  ;;  %v2075_v29 = vpop.eup %2074  ;;  %v1219_v9 = vmul.f32 %v2103_v3, %v2073_v53 }
 0x50a   :  { %2076 = vrcp.f32 %v1200_v28  ;;  %v1238_v5 = vmul.f32 %v2770_v37, %v1220_v45  ;;  %v1221_v16 = vmul.f32 %v2104_v6, %v2075_v29 }
 0x50b   :  { %2078 = vrcp.f32 %v1198_v11  ;;  %v1237_v14 = vmul.f32 %v2770_v37, %v1219_v9  ;;  %v2107_v11 = vld [vmem:[%s2862_s1 + $0x38] sm:$0xff] }
 0x50c   :  { %2080 = vrcp.f32 %v1201_v36  ;;  %v1239_v47 = vmul.f32 %v2770_v37, %v1221_v16 }
 0x50d   :  { %2082 = vrcp.f32 %v1199_v18 }
 0x50e   :  { %2084 = vrcp.f32 %v1202_v20  ;;  %v1192_v20 = vand.u32 2147483648, %v2765_v15 }
 0x50f   :  { %2086 = vrsqrt.f32 %v2686_v25 }
 0x510   :  { %2088 = vrsqrt.f32 %v2765_v15 }
 0x511   :  { %2090 = vrsqrt.f32 %v2688_v17 }
 0x517   :  { %v2077_v39 = vpop.eup %2076 }
 0x518   :  { %v2079_v43 = vpop.eup %2078  ;;  %v1224_v55 = vmul.f32 %v2105_v23, %v2077_v39  ;;  %v1185_v39 = vand.u32 2147483648, %v2688_v17  ;;  %v2110_v23 = vld [vmem:[%s2862_s1 + $0x48] sm:$0xff] }
 0x519   :  { %v1222_v61 = vmul.f32 %v2106_v30, %v2079_v43  ;;  %v2081_v62 = vpop.eup %2080 }
 0x51a   :  { %v1242_v0 = vmul.f32 %v2770_v37, %v1224_v55  ;;  %v2083_v4 = vpop.eup %2082  ;;  %v1225_v49 = vmul.f32 %v2107_v11, %v2081_v62  ;;  %v2111_v62 = vld [vmem:[%s2862_s1 + $0x50] sm:$0xff] }
 0x51b   :  { %v1240_v26 = vmul.f32 %v2770_v37, %v1222_v61  ;;  %v1223_v46 = vmul.f32 %v2108_v22, %v2083_v4  ;;  %v2085_v59 = vpop.eup %2084 }
 0x51c   :  { %v1243_v63 = vmul.f32 %v2770_v37, %v1225_v49  ;;  %v2087_v32 = vpop.eup %2086 }
 0x51d   :  { %v1241_v53 = vmul.f32 %v2770_v37, %v1223_v46  ;;  %v2089_v3 = vpop.eup %2088 }
 0x51e   :  { %v1251_v35 = vpop.permute.xlu1 %1250  ;;  %v2091_v6 = vpop.eup %2090 }
 0x51f   :  { %v1308_v60 = vmul.f32 %v1251_v35, %v1236_v38  ;;  %v1226_v35 = vmul.f32 %v2109_v13, %v2085_v59 }
 0x521   :  { %v1321_v54 = vsel %vm1320_vm13, %v1308_v60, 0.0  ;;  %v1244_v45 = vmul.f32 %v2770_v37, %v1226_v35 }
 0x522   :  { %v1261_v12 = vpop.permute.xlu1 %1260  ;;  %v1256_v10 = vpop.permute.xlu0 %1255 }
 0x523   :  { %v1310_v40 = vmul.f32 %v1261_v12, %v1238_v5  ;;  %v1309_v42 = vmul.f32 %v1256_v10, %v1237_v14  ;;  %v1174_v10 = vmul.f32 %v2087_v32, %v2686_v25  ;;  %v1188_v14 = vmul.f32 %v2089_v3, %v2765_v15 }
 0x525   :  { %v1322_v21 = vsel %vm1320_vm13, %v1310_v40, 0.0  ;;  %v1332_v19 = vsel %vm1320_vm13, %v1309_v42, 0.0  ;;  %v1176_v16 = vsel %vm1175_vm15, %v2686_v25, %v1174_v10  ;;  %v1190_v42 = vsel %vm1189_vm14, %v2765_v15, %v1188_v14 }
 0x526   :  { %v1323_v27 = vadd.f32 %v1322_v21, %v1321_v54  ;;  %v1266_v56 = vpop.permute.xlu1 %1265  ;;  %v1178_v54 = vand.u32 2147483648, %v2686_v25  ;;  %v1181_v21 = vmul.f32 %v2091_v6, %v2688_v17 }
 0x527   :  { %v1311_v50 = vmul.f32 %v1266_v56, %v1239_v47 }
 0x528   :  { %v1179_v47 = vsel %vm1177_vm1, %v1178_v54, %v1176_v16  ;;  %v1183_v56 = vsel %vm1182_vm2, %v2688_v17, %v1181_v21 }
 0x529   :  { %v1333_v24 = vsel %vm1320_vm13, %v1311_v50, 0.0  ;;  %v1203_v50 = vadd.f32 1.0, %v1179_v47 }
 0x52a   :  { %v1334_v58 = vadd.f32 %v1333_v24, %v1332_v19  ;;  %v1186_v24 = vsel %vm1184_vm3, %v1185_v39, %v1183_v56 }
 0x52b   :  { %2092 = vrcp.f32 %v1203_v50 }
 0x52d   :  { %v1281_v1 = vpop.permute.xlu1 %1280 }
 0x52e   :  { %v1314_v28 = vmul.f32 %v1281_v1, %v1242_v0 }
 0x530   :  { %v1326_v48 = vsel %vm1320_vm13, %v1314_v28, 0.0 }
 0x531   :  { %v1271_v33 = vpop.permute.xlu1 %1270 }
 0x532   :  { %v1312_v34 = vmul.f32 %v1271_v33, %v1240_v26 }
 0x534   :  { %v1324_v2 = vsel %vm1320_vm13, %v1312_v34, 0.0 }
 0x535   :  { %v1325_v7 = vadd.f32 %v1324_v2, %v1323_v27  ;;  %v1286_v51 = vpop.permute.xlu1 %1285  ;;  %v1193_v27 = vsel %vm1191_vm0, %v1192_v20, %v1190_v42 }
 0x536   :  { %v1315_v8 = vmul.f32 %v1286_v51, %v1243_v63  ;;  %v1205_v19 = vadd.f32 1.0, %v1193_v27 }
 0x537   :  { %v1327_v31 = vadd.f32 %v1326_v48, %v1325_v7 }
 0x538   :  { %v1337_v60 = vsel %vm1320_vm13, %v1315_v8, 0.0  ;;  %2094 = vrcp.f32 %v1205_v19  ;;  %v2093_v15 = vpop.eup %2092 }
 0x539   :  { %v1276_v36 = vpop.permute.xlu1 %1275  ;;  %v1227_v55 = vmul.f32 %v2110_v23, %v2093_v15 }
 0x53a   :  { %v1313_v38 = vmul.f32 %v1276_v36, %v1241_v53 }
 0x53b   :  { %v1245_v17 = vmul.f32 %v2770_v37, %v1227_v55 }
 0x53c   :  { %v1335_v41 = vsel %vm1320_vm13, %v1313_v38, 0.0 }
 0x53d   :  { %v1336_v29 = vadd.f32 %v1335_v41, %v1334_v58  ;;  %v1291_v18 = vpop.permute.xlu1 %1290  ;;  %v1204_v58 = vadd.f32 1.0, %v1186_v24 }
 0x53e   :  { %v1316_v5 = vmul.f32 %v1291_v18, %v1244_v45 }
 0x53f   :  { %v1338_v9 = vadd.f32 %v1337_v60, %v1336_v29  ;;  %2096 = vrcp.f32 %v1204_v58 }
 0x540   :  { %v1328_v12 = vsel %vm1320_vm13, %v1316_v5, 0.0 }
 0x541   :  { %v1329_v40 = vadd.f32 %v1328_v12, %v1327_v31 }
 0x545   :  { %v2095_v43 = vpop.eup %2094 }
 0x546   :  { %v1229_v25 = vmul.f32 %v2561_v57, %v2095_v43 }
 0x548   :  { %v1247_v61 = vmul.f32 %v2770_v37, %v1229_v25 }
 0x54c   :  { %v2097_v1 = vpop.eup %2096 }
 0x54d   :  { %v1228_v0 = vmul.f32 %v2111_v62, %v2097_v1 }
 0x54f   :  { %v1246_v28 = vmul.f32 %v2770_v37, %v1228_v0 }
 0x561   :  { %v1306_v30 = vpop.permute.xlu0 %1305 }
 0x562   :  { %v1319_v4 = vmul.f32 %v1306_v30, %v1247_v61 }
 0x564   :  { %v1341_v11 = vsel %vm1320_vm13, %v1319_v4, 0.0 }
 0x565   :  { %v1296_v26 = vpop.permute.xlu1 %1295 }
 0x566   :  { %v1317_v33 = vmul.f32 %v1296_v26, %v1245_v17 }
 0x568   :  { %v1339_v57 = vsel %vm1320_vm13, %v1317_v33, 0.0 }
 0x569   :  { %v1340_v34 = vadd.f32 %v1339_v57, %v1338_v9  ;;  %v1301_v2 = vpop.permute.xlu1 %1300 }
 0x56a   :  { %v1318_v49 = vmul.f32 %v1301_v2, %v1246_v28 }
 0x56b   :  { %v1342_v22 = vadd.f32 %v1341_v11, %v1340_v34 }
 0x56c   :  { %v1330_v46 = vsel %vm1320_vm13, %v1318_v49, 0.0 }
 0x56d   :  { %v1331_v59 = vadd.f32 %v1330_v46, %v1329_v40  ;;  %1347 = vrot.lane.b32.xlu0 %v1342_v22, %s2119_s3 }
 0x56f   :  { %1345 = vrot.lane.b32.xlu1 %v1331_v59, %s2119_s3 }
 0x5df   :  { %v1348_v7 = vpop.permute.xlu0 %1347 }
 0x5e0   :  { %v1352_v51 = vadd.f32 %v2722_v44, %v1348_v7 }
 0x5e1   :  { %v1346_v48 = vpop.permute.xlu1 %1345 }
 0x5e2   :  { %1615 = vst.msk [vmem:[%s2864_s4 + $0x8] sm:$0xff] %vm1613_vm4, %v1352_v51  ;;  %v1351_v37 = vadd.f32 %v2705_v52, %v1346_v48 }
 0x5e4   :  { %1614 = vst.msk [vmem:[%s2864_s4] sm:$0xff] %vm1613_vm4, %v1351_v37 }

</bundles_post_ra>
